<compile_context>
chip_gen: v5e
topology: v5e:2x2
jax: 0.10.0
libtpu: 0.0.40
codegen_flags: <defaults>
</compile_context>

<pallas_src>
import jax
import jax.numpy as jnp
import numpy as np
from jax import lax
from jax.experimental import pallas as pl
from jax.experimental.pallas import tpu as pltpu


# ----------------------------------------------------------------------------
# Path 1: small tables resident in VMEM (one-hot MXU gather, lane-dense out).
# ----------------------------------------------------------------------------
def bpr_resident_kernel(uids_ref, iids_ref, jids_ref,   # (1, TB) int32 id tiles (VMEM)
                        ut_ref, it_ref,                  # (D, n_users)/(D, n_items) f32, resident
                        pred_i_ref, pred_j_ref):         # (1, TB) f32 lane-dense output tiles
    tb = uids_ref.shape[1]

    def gather_cols(table_t_ref, ids):
        # Gather embedding rows (= columns of the transposed table) with a
        # one-hot matmul on the MXU.  One-hot entries are exactly 0/1 and
        # precision=HIGHEST keeps the f32 table values exact, so this gather
        # is numerically exact.
        n = table_t_ref.shape[1]
        onehot = (lax.broadcasted_iota(jnp.int32, (n, tb), 0) == ids).astype(jnp.float32)
        return jnp.dot(table_t_ref[...], onehot,
                       preferred_element_type=jnp.float32,
                       precision=jax.lax.Precision.HIGHEST)          # (D, TB)

    u = gather_cols(ut_ref, uids_ref[...])
    vi = gather_cols(it_ref, iids_ref[...])
    vj = gather_cols(it_ref, jids_ref[...])

    # D lives on sublanes, batch on lanes -> the sublane reduction result is
    # already lane-major and the (1, TB) store is a dense, unmasked vst.
    pred_i_ref[...] = jnp.sum(u * vi, axis=0, keepdims=True)
    pred_j_ref[...] = jnp.sum(u * vj, axis=0, keepdims=True)


# ----------------------------------------------------------------------------
# Path 2: large tables stay in HBM; double-buffered per-row gather DMAs.
# ----------------------------------------------------------------------------
def bpr_hbm_gather_kernel(user_ids_ref, item_i_ids_ref, item_j_ids_ref,  # SMEM (b_pad,) int32
                          u_hbm, i_hbm,                                   # HBM tables (pl.ANY)
                          pred_i_ref, pred_j_ref,                         # (TB, 1) f32 output tiles
                          u_buf, i_buf, j_buf, sems):                     # (2, TB, D) scratch, sems (2,3)
    tb = u_buf.shape[1]
    t = pl.program_id(0)
    nt = pl.num_programs(0)
    slot = t % 2

    def issue(tile, slot_):
        # Issue all 3*TB row-gather DMAs for `tile` into buffer slot `slot_`.
        # Rolled loop (small unroll) keeps code size flat as tile_b grows; the
        # descriptor issue rate is bounded by the vector-misc slot anyway.
        base = tile * tb

        def body(b, carry):
            uid = user_ids_ref[base + b]
            iid = item_i_ids_ref[base + b]
            jid = item_j_ids_ref[base + b]
            pltpu.make_async_copy(u_hbm.at[pl.ds(uid, 1), :],
                                  u_buf.at[slot_, pl.ds(b, 1), :], sems.at[slot_, 0]).start()
            pltpu.make_async_copy(i_hbm.at[pl.ds(iid, 1), :],
                                  i_buf.at[slot_, pl.ds(b, 1), :], sems.at[slot_, 1]).start()
            pltpu.make_async_copy(i_hbm.at[pl.ds(jid, 1), :],
                                  j_buf.at[slot_, pl.ds(b, 1), :], sems.at[slot_, 2]).start()
            return carry

        lax.fori_loop(0, tb, body, 0, unroll=8)

    def wait(slot_):
        # Per-row waits on the shared per-(slot, stream) semaphores (each wait
        # decrements by exactly one row copy, so counts always balance); the
        # semaphore array no longer scales with tile_b.
        def body(b, carry):
            pltpu.make_async_copy(u_hbm.at[pl.ds(0, 1), :],
                                  u_buf.at[slot_, pl.ds(b, 1), :], sems.at[slot_, 0]).wait()
            pltpu.make_async_copy(i_hbm.at[pl.ds(0, 1), :],
                                  i_buf.at[slot_, pl.ds(b, 1), :], sems.at[slot_, 1]).wait()
            pltpu.make_async_copy(i_hbm.at[pl.ds(0, 1), :],
                                  j_buf.at[slot_, pl.ds(b, 1), :], sems.at[slot_, 2]).wait()
            return carry

        lax.fori_loop(0, tb, body, 0)

    @pl.when(t == 0)
    def _():
        issue(0, 0)                       # prime the pipeline

    @pl.when(t + 1 < nt)
    def _():
        issue(t + 1, 1 - slot)            # prefetch next tile before waiting on this one

    wait(slot)

    # Fused per-row dot products (VPU multiply + XLU lane reduce); no concat.
    u = u_buf[slot]
    pred_i_ref[...] = jnp.sum(u * i_buf[slot], axis=-1, keepdims=True)
    pred_j_ref[...] = jnp.sum(u * j_buf[slot], axis=-1, keepdims=True)
    # TODO(synk): lane-dense output tiles for this path too (needs a sublane->
    # lane transpose of the per-row sums); the per-row gather DMAs dominate here.


# ----------------------------------------------------------------------------
# Wrapper
# ----------------------------------------------------------------------------
def _round_up(x, m):
    return ((x + m - 1) // m) * m


def _prep_ids(ids, n_rows, b_pad):
    # Clamp (an out-of-range id would otherwise become a faulting DMA / empty
    # one-hot) and pad the batch up to a whole tile with row 0; padded rows are
    # discarded by the [:B] slice in the wrapper.
    ids = jnp.clip(ids.astype(jnp.int32), 0, n_rows - 1)
    return jnp.pad(ids, (0, b_pad - ids.shape[0]))


def bpr_forward(user_ids, item_i_ids, item_j_ids, U, I, *,
                tile_b=256,
                table_vmem_budget_bytes=8 * 1024 * 1024,   # safe on v5e/v6e/v7x (v7x VMEM is 64 MiB)
                max_onehot_rows=2048,
                force_hbm_gather=False):
    """Returns (pred_i, pred_j), each shape (B,) float32."""
    B = user_ids.shape[0]
    num_users, D = U.shape
    num_items = I.shape[0]

    # Lane-dense batch tiles: multiples of 128, as large as the batch allows.
    tile_b = min(tile_b, _round_up(B, 128))
    tile_b = max(128, (tile_b // 128) * 128)
    num_tiles = pl.cdiv(B, tile_b)
    b_pad = num_tiles * tile_b

    # Fast path when both tables (double-buffered by the pipeline) plus the
    # one-hot intermediates comfortably fit VMEM.
    table_bytes = (num_users + num_items) * D * 4
    use_resident = (not force_hbm_gather
                    and 2 * table_bytes <= table_vmem_budget_bytes
                    and max(num_users, num_items) <= max_onehot_rows)

    uids = _prep_ids(user_ids, num_users, b_pad)
    iids = _prep_ids(item_i_ids, num_items, b_pad)
    jids = _prep_ids(item_j_ids, num_items, b_pad)

    if use_resident:
        # NOTE: tables could be stored bf16 to halve HBM traffic (biggest win
        # on v5e); kept f32 here for exact parity with the PyTorch reference.
        ut = jnp.asarray(U, jnp.float32).T          # (D, num_users)
        it = jnp.asarray(I, jnp.float32).T          # (D, num_items)

        def vec_spec():
            return pl.BlockSpec((1, tile_b), lambda t: (0, t))

        def table_spec(n):
            return pl.BlockSpec((D, n), lambda t: (0, 0))   # resident across all steps

        pred_i, pred_j = pl.pallas_call(
            bpr_resident_kernel,
            grid=(num_tiles,),
            in_specs=[vec_spec(), vec_spec(), vec_spec(),
                      table_spec(num_users), table_spec(num_items)],
            out_specs=(vec_spec(), vec_spec()),
            out_shape=(jax.ShapeDtypeStruct((1, b_pad), jnp.float32),
                       jax.ShapeDtypeStruct((1, b_pad), jnp.float32)),
            compiler_params=pltpu.CompilerParams(
                dimension_semantics=("parallel",)),   # free 2x on v7x when num_tiles >= 2
        )(uids.reshape(1, b_pad), iids.reshape(1, b_pad), jids.reshape(1, b_pad), ut, it)
        return pred_i[0, :B], pred_j[0, :B]

    # Large-table fallback: HBM-resident tables + double-buffered row gathers.
    U = jnp.asarray(U, jnp.float32)
    I = jnp.asarray(I, jnp.float32)
    grid_spec = pltpu.PrefetchScalarGridSpec(
        num_scalar_prefetch=3,                       # ids -> SMEM
        grid=(num_tiles,),
        in_specs=[
            pl.BlockSpec(memory_space=pl.ANY),       # U table stays in HBM
            pl.BlockSpec(memory_space=pl.ANY),       # I table stays in HBM
        ],
        out_specs=(
            pl.BlockSpec((tile_b, 1), lambda t, u, i, j: (t, 0)),
            pl.BlockSpec((tile_b, 1), lambda t, u, i, j: (t, 0)),
        ),
        scratch_shapes=[
            pltpu.VMEM((2, tile_b, D), jnp.float32),   # user rows   (double buffered)
            pltpu.VMEM((2, tile_b, D), jnp.float32),   # item_i rows
            pltpu.VMEM((2, tile_b, D), jnp.float32),   # item_j rows
            pltpu.SemaphoreType.DMA((2, 3)),           # one sem per (slot, stream)
        ],
    )
    pred_i, pred_j = pl.pallas_call(
        bpr_hbm_gather_kernel,
        grid_spec=grid_spec,
        out_shape=(
            jax.ShapeDtypeStruct((b_pad, 1), jnp.float32),
            jax.ShapeDtypeStruct((b_pad, 1), jnp.float32),
        ),
        compiler_params=pltpu.CompilerParams(
            # Cross-grid-step prefetch state (slot parity + in-flight DMAs)
            # forbids sharding this grid axis across cores.
            dimension_semantics=("arbitrary",)),
    )(uids, iids, jids, U, I)
    return pred_i[:B, 0], pred_j[:B, 0]


def xavier_uniform(key, shape):
    fan_in, fan_out = shape[0], shape[1]
    bound = float(np.sqrt(6.0 / (fan_in + fan_out)))
    return jax.random.uniform(key, shape, jnp.float32, -bound, bound)


if __name__ == "__main__":
    num_users, num_items, dimension = 64, 128, 32
    batch = 10   # deliberately not a multiple of the tile -> exercises padding

    key = jax.random.PRNGKey(0)
    keys = jax.random.split(key, 8)

    # nn.Embedding weights, xavier_uniform_ init (deterministic, in-script).
    U = xavier_uniform(keys[0], (num_users, dimension))
    I = xavier_uniform(keys[1], (num_items, dimension))

    user_ids = jax.random.randint(keys[2], (batch,), 0, num_users, jnp.int32)
    item_i_ids = jax.random.randint(keys[3], (batch,), 0, num_items, jnp.int32)
    item_j_ids = jax.random.randint(keys[4], (batch,), 0, num_items, jnp.int32)

    def ref(u_ids, i_ids, j_ids):
        return (jnp.sum(U[u_ids] * I[i_ids], axis=-1),
                jnp.sum(U[u_ids] * I[j_ids], axis=-1))

    # --- Fast path: VMEM-resident tables, one-hot MXU gather, lane-dense out.
    pred_i, pred_j = bpr_forward(user_ids, item_i_ids, item_j_ids, U, I)
    jax.block_until_ready((pred_i, pred_j))
    ref_i, ref_j = ref(user_ids, item_i_ids, item_j_ids)
    assert pred_i.shape == (batch,) and pred_j.shape == (batch,)
    assert np.allclose(np.asarray(pred_i), np.asarray(ref_i), rtol=1e-4, atol=1e-5)
    assert np.allclose(np.asarray(pred_j), np.asarray(ref_j), rtol=1e-4, atol=1e-5)

    # --- Large-table fallback path, forced so both code paths are exercised
    # (batch of 300 with tile_b=128 -> 3 grid tiles -> cross-step prefetch).
    batch2 = 300
    u2 = jax.random.randint(keys[5], (batch2,), 0, num_users, jnp.int32)
    i2 = jax.random.randint(keys[6], (batch2,), 0, num_items, jnp.int32)
    j2 = jax.random.randint(keys[7], (batch2,), 0, num_items, jnp.int32)
    pred_i2, pred_j2 = bpr_forward(u2, i2, j2, U, I, tile_b=128, force_hbm_gather=True)
    jax.block_until_ready((pred_i2, pred_j2))
    ref_i2, ref_j2 = ref(u2, i2, j2)
    assert pred_i2.shape == (batch2,) and pred_j2.shape == (batch2,)
    assert np.allclose(np.asarray(pred_i2), np.asarray(ref_i2), rtol=1e-5, atol=1e-5)
    assert np.allclose(np.asarray(pred_j2), np.asarray(ref_j2), rtol=1e-5, atol=1e-5)

    print("KERNEL_OK")
</pallas_src>

<mosaic_0001>
module attributes {stable_mosaic.version = 11 : i64} {
  func.func @bpr_resident_kernel(%arg0: i32, %arg1: memref<1x128xi32, #tpu.memory_space<vmem>>, %arg2: memref<1x128xi32, #tpu.memory_space<vmem>>, %arg3: memref<1x128xi32, #tpu.memory_space<vmem>>, %arg4: memref<32x64xf32, #tpu.memory_space<vmem>>, %arg5: memref<32x128xf32, #tpu.memory_space<vmem>>, %arg6: memref<1x128xf32, #tpu.memory_space<vmem>>, %arg7: memref<1x128xf32, #tpu.memory_space<vmem>>) attributes {dimension_semantics = [#tpu.dimension_semantics<parallel>], iteration_bounds = array<i64: 1>, scalar_prefetch = 0 : i64, scratch_operands = 0 : i64, tpu.core_type = #tpu.core_type<tc>, window_params = [{transform_indices = @transform_0, window_bounds = array<i64: 1, 128>}, {transform_indices = @transform_1, window_bounds = array<i64: 1, 128>}, {transform_indices = @transform_2, window_bounds = array<i64: 1, 128>}, {pipeline_mode = #tpu.pipeline_mode<synchronous>, transform_indices = @transform_3, window_bounds = array<i64: 32, 64>}, {pipeline_mode = #tpu.pipeline_mode<synchronous>, transform_indices = @transform_4, window_bounds = array<i64: 32, 128>}, {transform_indices = @transform_5, window_bounds = array<i64: 1, 128>}, {transform_indices = @transform_6, window_bounds = array<i64: 1, 128>}]} {
    %c0 = arith.constant 0 : index
    %c0_0 = arith.constant 0 : index
    %0 = vector.load %arg1[%c0, %c0_0] : memref<1x128xi32, #tpu.memory_space<vmem>>, vector<1x128xi32>
    %1 = tpu.iota {dimensions = array<i32: 0>} : vector<64x128xi32>
    %2 = vector.broadcast %0 : vector<1x128xi32> to vector<64x128xi32>
    %3 = arith.cmpi eq, %1, %2 : vector<64x128xi32>
    %4 = arith.extui %3 : vector<64x128xi1> to vector<64x128xi32>
    %5 = arith.sitofp %4 : vector<64x128xi32> to vector<64x128xf32>
    %c0_1 = arith.constant 0 : index
    %c0_2 = arith.constant 0 : index
    %6 = vector.load %arg4[%c0_1, %c0_2] : memref<32x64xf32, #tpu.memory_space<vmem>>, vector<32x64xf32>
    %cst = arith.constant dense<0.000000e+00> : vector<32x128xf32>
    %7 = tpu.matmul %6, %5, %cst {dimension_numbers = #tpu.dot_dimension_numbers<[1], [0], [0], [1], [0, 0, 1, 1], [], []>, precision = #tpu.contract_precision<fp32>} : vector<32x64xf32>, vector<64x128xf32>, vector<32x128xf32> -> vector<32x128xf32>
    %c0_3 = arith.constant 0 : index
    %c0_4 = arith.constant 0 : index
    %8 = vector.load %arg2[%c0_3, %c0_4] : memref<1x128xi32, #tpu.memory_space<vmem>>, vector<1x128xi32>
    %9 = tpu.iota {dimensions = array<i32: 0>} : vector<128x128xi32>
    %10 = vector.broadcast %8 : vector<1x128xi32> to vector<128x128xi32>
    %11 = arith.cmpi eq, %9, %10 : vector<128x128xi32>
    %12 = arith.extui %11 : vector<128x128xi1> to vector<128x128xi32>
    %13 = arith.sitofp %12 : vector<128x128xi32> to vector<128x128xf32>
    %c0_5 = arith.constant 0 : index
    %c0_6 = arith.constant 0 : index
    %14 = vector.load %arg5[%c0_5, %c0_6] : memref<32x128xf32, #tpu.memory_space<vmem>>, vector<32x128xf32>
    %cst_7 = arith.constant dense<0.000000e+00> : vector<32x128xf32>
    %15 = tpu.matmul %14, %13, %cst_7 {dimension_numbers = #tpu.dot_dimension_numbers<[1], [0], [0], [1], [0, 0, 1, 1], [], []>, precision = #tpu.contract_precision<fp32>} : vector<32x128xf32>, vector<128x128xf32>, vector<32x128xf32> -> vector<32x128xf32>
    %c0_8 = arith.constant 0 : index
    %c0_9 = arith.constant 0 : index
    %16 = vector.load %arg3[%c0_8, %c0_9] : memref<1x128xi32, #tpu.memory_space<vmem>>, vector<1x128xi32>
    %17 = tpu.iota {dimensions = array<i32: 0>} : vector<128x128xi32>
    %18 = vector.broadcast %16 : vector<1x128xi32> to vector<128x128xi32>
    %19 = arith.cmpi eq, %17, %18 : vector<128x128xi32>
    %20 = arith.extui %19 : vector<128x128xi1> to vector<128x128xi32>
    %21 = arith.sitofp %20 : vector<128x128xi32> to vector<128x128xf32>
    %c0_10 = arith.constant 0 : index
    %c0_11 = arith.constant 0 : index
    %22 = vector.load %arg5[%c0_10, %c0_11] : memref<32x128xf32, #tpu.memory_space<vmem>>, vector<32x128xf32>
    %cst_12 = arith.constant dense<0.000000e+00> : vector<32x128xf32>
    %23 = tpu.matmul %22, %21, %cst_12 {dimension_numbers = #tpu.dot_dimension_numbers<[1], [0], [0], [1], [0, 0, 1, 1], [], []>, precision = #tpu.contract_precision<fp32>} : vector<32x128xf32>, vector<128x128xf32>, vector<32x128xf32> -> vector<32x128xf32>
    %24 = arith.mulf %7, %15 : vector<32x128xf32>
    %cst_13 = arith.constant dense<0.000000e+00> : vector<128xf32>
    %25 = vector.multi_reduction <add>, %24, %cst_13 [0] : vector<32x128xf32> to vector<128xf32>
    %26 = vector.shape_cast %25 : vector<128xf32> to vector<1x128xf32>
    %c0_14 = arith.constant 0 : index
    %c0_15 = arith.constant 0 : index
    %27 = vector.load %arg6[%c0_14, %c0_15] : memref<1x128xf32, #tpu.memory_space<vmem>>, vector<1x128xf32>
    tpu.vector_store %arg6[%c0_14, %c0_15], %26 {strides = array<i32>} : memref<1x128xf32, #tpu.memory_space<vmem>>, vector<1x128xf32>,
    %28 = arith.mulf %7, %23 : vector<32x128xf32>
    %cst_16 = arith.constant dense<0.000000e+00> : vector<128xf32>
    %29 = vector.multi_reduction <add>, %28, %cst_16 [0] : vector<32x128xf32> to vector<128xf32>
    %30 = vector.shape_cast %29 : vector<128xf32> to vector<1x128xf32>
    %c0_17 = arith.constant 0 : index
    %c0_18 = arith.constant 0 : index
    %31 = vector.load %arg7[%c0_17, %c0_18] : memref<1x128xf32, #tpu.memory_space<vmem>>, vector<1x128xf32>
    tpu.vector_store %arg7[%c0_17, %c0_18], %30 {strides = array<i32>} : memref<1x128xf32, #tpu.memory_space<vmem>>, vector<1x128xf32>,
    return
  }
  func.func @transform_0(%arg0: i32) -> (i32, i32) {
    %c0_i32 = arith.constant 0 : i32
    %c0_i32_0 = arith.constant 0 : i32
    return %c0_i32, %arg0 : i32, i32
  }
  func.func @transform_1(%arg0: i32) -> (i32, i32) {
    %c0_i32 = arith.constant 0 : i32
    %c0_i32_0 = arith.constant 0 : i32
    return %c0_i32, %arg0 : i32, i32
  }
  func.func @transform_2(%arg0: i32) -> (i32, i32) {
    %c0_i32 = arith.constant 0 : i32
    %c0_i32_0 = arith.constant 0 : i32
    return %c0_i32, %arg0 : i32, i32
  }
  func.func @transform_3(%arg0: i32) -> (i32, i32) {
    %c0_i32 = arith.constant 0 : i32
    %c0_i32_0 = arith.constant 0 : i32
    %c0_i32_1 = arith.constant 0 : i32
    return %c0_i32, %c0_i32_0 : i32, i32
  }
  func.func @transform_4(%arg0: i32) -> (i32, i32) {
    %c0_i32 = arith.constant 0 : i32
    %c0_i32_0 = arith.constant 0 : i32
    %c0_i32_1 = arith.constant 0 : i32
    return %c0_i32, %c0_i32_0 : i32, i32
  }
  func.func @transform_5(%arg0: i32) -> (i32, i32) {
    %c0_i32 = arith.constant 0 : i32
    %c0_i32_0 = arith.constant 0 : i32
    return %c0_i32, %arg0 : i32, i32
  }
  func.func @transform_6(%arg0: i32) -> (i32, i32) {
    %c0_i32 = arith.constant 0 : i32
    %c0_i32_0 = arith.constant 0 : i32
    return %c0_i32, %arg0 : i32, i32
  }
}

</mosaic_0001>

<bundles_post_ra>
// kernel: tpu_custom_call.1
= control target key start
LH: loop header
LB: loop body
LE: loop exit
PB: predicated region body
PF: predicated region fallthrough
CT: control target
= control target key end

     0   :  { %12 = vsyncpa [#allocation3], 0  ;;  %s3239_s0 = inlined_call_operand.hbm [shape: s32[1,128], index: 0, kind: input, shape index: {}]   ;;  %s3240_s1 = inlined_call_operand.hbm [shape: s32[1,128], index: 1, kind: input, shape index: {}]   ;;  %s3241_s2 = inlined_call_operand.vmem [shape: s32[1,128], index: 2, kind: input, shape index: {}]   ;;  %s3242_s3 = inlined_call_operand.hbm [shape: f32[32,64], index: 3, kind: input, shape index: {}]   ;;  %s3243_s4 = inlined_call_operand.hbm [shape: f32[32,128], index: 4, kind: input, shape index: {}]   ;;  %s3244_s5 = inlined_call_operand.hbm [shape: f32[1,128], index: 5, kind: output, shape index: {0}]   ;;  %s3245_s6 = inlined_call_operand.hbm [shape: f32[1,128], index: 6, kind: output, shape index: {1}]  }
   0x1   :  { %13 = vsyncpa [#allocation6], 0 }
   0x2   :  { %14 = vsyncpa [#allocation9], 0 }
   0x3   :  { %15 = vsyncpa [#allocation4], 0  ;;  %s33_s23 = sshll.u32 %s3240_s1, 4  ;;  %s34_s23 = int_to_ptr.hbm [resolvable:$true] %s33_s23 }
   0x4   :  { %16 = vsyncpa [#allocation12], 0  ;;  %s1851_s24 = smov [#allocation5]   ;;  %s22_s28 = sshll.u32 %s3239_s0, 4  ;;  %s23_s28 = int_to_ptr.hbm [resolvable:$true] %s22_s28 }
   0x5   :  { %s35_s25 = sshll.u32 %s1851_s24, 4  ;;  %s1852_s29 = smov [#allocation2]   ;;  %s36_s25 = int_to_ptr.vmem [resolvable:$true] %s35_s25 }
   0x6   :  { %38 = dma.hbm_to_vmem [thread:$0]  %s34_s23, 16, %s36_s25, [#allocation6]  }
   0x7   :  { %s24_s30 = sshll.u32 %s1852_s29, 4  ;;  %s45_s9 = sshll.u32 %s3242_s3, 4  ;;  %s25_s30 = int_to_ptr.vmem [resolvable:$true] %s24_s30  ;;  %s46_s9 = int_to_ptr.hbm [resolvable:$true] %s45_s9 }
   0x8   :  { %27 = dma.hbm_to_vmem [thread:$0]  %s23_s28, 16, %s25_s30, [#allocation3]  }
   0x9   :  { %s1853_s1 = smov [#allocation7]   ;;  %s58_s13 = sshll.u32 %s3243_s4, 4  ;;  %s59_s13 = int_to_ptr.hbm [resolvable:$true] %s58_s13 }
   0xa   :  { %s47_s10 = sshll.u32 %s1853_s1, 4  ;;  %s1854_s14 = smov 128   ;;  %s48_s10 = int_to_ptr.vmem [resolvable:$true] %s47_s10 }
   0xb   :  { %s1855_s0 = smov 8   ;;  %s1856_s15 = smov [#allocation8]  }
   0xc   :  { %53 = dma.hbm_to_vmem [thread:$0]  %s46_s9, 512, %s48_s10, [#allocation6], %s1854_s14, %s1854_s14, %s1855_s0  }
   0xd   :  { %s60_s16 = sshll.u32 %s1856_s15, 4  ;;  %s61_s16 = int_to_ptr.vmem [resolvable:$true] %s60_s16 }
   0xe   :  { %66 = dma.hbm_to_vmem [thread:$0]  %s59_s13, 512, %s61_s16, [#allocation9], %s1854_s14, %s1854_s14, %s1855_s0  }
   0xf   :  { %1841 = dma.done.wait [#allocation3], 16  }
  0x10   :  { %1842 = vsyncadd [#allocation3], 4294967280 }
  0x11   :  { %1843 = dma.done.wait [#allocation6], 528  }
  0x12   :  { %1844 = vsyncadd [#allocation6], 4294966768 }
  0x13   :  { %1845 = dma.done.wait [#allocation9], 512  }
  0x14   :  { %1846 = vsyncadd [#allocation9], 4294966784  ;;  %v84_v0 = vlaneseq  ;;  %vm122_vm0 = vcmask 523264   ;;  %v1694_v8 = vld [vmem:[#allocation2] ss:$0 sm:$0xff]  ;;  %v120_v10 = vld [vmem:[#allocation7 + $0x10] sm:$0xff] }
  0x15   :  { %v130_v11 = vsel %vm122_vm0, %v120_v10, 0  ;;  %v1857_v16 = vmov 1.0   ;;  %v1858_v18 = vmov 0.0   ;;  %v121_v46 = vld [vmem:[#allocation7 + $0x18] sm:$0xff]  ;;  %v118_v53 = vld [vmem:[#allocation7] sm:$0xff]  ;;  %s1480_s20 = sshll.u32 %s3244_s5, 4  ;;  %s1481_s20 = int_to_ptr.hbm [resolvable:$true] %s1480_s20 }
  0x16   :  { %v1908_v1 = vshrl.u32 %v84_v0, 7  ;;  %v1996_v28 = vand.u32 4294901760, %v130_v11  ;;  %v133_v56 = vsel %vm122_vm0, %v121_v46, 0  ;;  %v124_v0 = vsel %vm122_vm0, %v118_v53, 0  ;;  %s1860_s5 = smov [#allocation11]   ;;  %s1491_s24 = sshll.u32 %s3245_s6, 4  ;;  %s1492_s24 = int_to_ptr.hbm [resolvable:$true] %s1491_s24 }
  0x17   :  { %v2075_v60 = vand.u32 4294901760, %v133_v56  ;;  %v2095_v10 = vand.u32 4294901760, %v124_v0  ;;  %s1489_s21 = sshll.u32 %s1860_s5, 4  ;;  %s1490_s21 = int_to_ptr.vmem [resolvable:$true] %s1489_s21 }
  0x18   :  { %v1911_v2 = vadd.s32 56, %v1908_v1  ;;  %v1914_v3 = vadd.s32 48, %v1908_v1  ;;  %v1917_v4 = vadd.s32 40, %v1908_v1  ;;  %v1920_v5 = vadd.s32 32, %v1908_v1 }
  0x19   :  { %v1923_v6 = vadd.s32 24, %v1908_v1  ;;  %v1926_v7 = vadd.s32 16, %v1908_v1  ;;  %v1929_v9 = vadd.s32 8, %v1908_v1  ;;  %vm1992_vm8 = vcmp.eq.s32.totalorder %v1908_v1, %v1694_v8 }
  0x1a   :  { %vm1933_vm1 = vcmp.eq.s32.totalorder %v1911_v2, %v1694_v8  ;;  %vm1938_vm2 = vcmp.eq.s32.totalorder %v1914_v3, %v1694_v8  ;;  %vm1943_vm3 = vcmp.eq.s32.totalorder %v1917_v4, %v1694_v8  ;;  %vm1948_vm4 = vcmp.eq.s32.totalorder %v1920_v5, %v1694_v8 }
  0x1b   :  { %1668 = vmatpush.msk.msra.mxu2 %vm1933_vm1, %v1857_v16  ;;  %vm1956_vm5 = vcmp.eq.s32.totalorder %v1923_v6, %v1694_v8  ;;  %v1515_v19 = vsel %vm1933_vm1, 1.0, %v1858_v18  ;;  %vm1964_vm6 = vcmp.eq.s32.totalorder %v1926_v7, %v1694_v8  ;;  %v1514_v21 = vsel %vm1938_vm2, 1.0, %v1858_v18  ;;  %1516 = vmatpush.msk.msra.mxu0 %vm1933_vm1, %v1857_v16 }
  0x1c   :  { %v1974_v22 = vsub.f32 %v1515_v19, %v1515_v19  ;;  %v1976_v23 = vsub.f32 %v1514_v21, %v1514_v21  ;;  %vm1979_vm7 = vcmp.eq.s32.totalorder %v1929_v9, %v1694_v8  ;;  %v1513_v25 = vsel %vm1943_vm3, 1.0, %v1858_v18 }
  0x1d   :  { %1669 = vmatpush.msk.msra.mxu2 %vm1938_vm2, %v1857_v16  ;;  %v1989_v26 = vsub.f32 %v1513_v25, %v1513_v25  ;;  %v1512_v29 = vsel %vm1948_vm4, 1.0, %v1858_v18  ;;  %1517 = vmatpush.msk.msra.mxu0 %vm1938_vm2, %v1857_v16  ;;  %v1511_v33 = vsel %vm1956_vm5, 1.0, %v1858_v18  ;;  %v2016_v35 = vsub.f32 %v130_v11, %v1996_v28  ;;  %v119_v11 = vld [vmem:[#allocation7 + $0x8] sm:$0xff] }
  0x1e   :  { %v202_v30 = vand.u32 4294901760, %v1974_v22  ;;  %v208_v31 = vand.u32 4294901760, %v1976_v23  ;;  %v2006_v32 = vsub.f32 %v1512_v29, %v1512_v29  ;;  %v2018_v36 = vsub.f32 %v1511_v33, %v1511_v33 }
  0x1f   :  { %1670 = vmatpush.msk.msra.mxu2 %vm1943_vm3, %v1857_v16  ;;  %v214_v34 = vand.u32 4294901760, %v1989_v26  ;;  %v1510_v37 = vsel %vm1964_vm6, 1.0, %v1858_v18  ;;  %1518 = vmatpush.msk.msra.mxu0 %vm1943_vm3, %v1857_v16  ;;  %v177_v43 = vand.u32 4294901760, %v2016_v35  ;;  %v1509_v45 = vsel %vm1979_vm7, 1.0, %v1858_v18 }
  0x20   :  { %v203_v38 = vsub.f32 %v1974_v22, %v202_v30  ;;  %v209_v39 = vsub.f32 %v1976_v23, %v208_v31  ;;  %v220_v40 = vand.u32 4294901760, %v2006_v32  ;;  %v2033_v41 = vsub.f32 %v1510_v37, %v1510_v37 }
  0x21   :  { %1671 = vmatpush.msk.msra.mxu2 %vm1948_vm4, %v1857_v16  ;;  %v215_v42 = vsub.f32 %v1989_v26, %v214_v34  ;;  %v226_v44 = vand.u32 4294901760, %v2018_v36  ;;  %1519 = vmatpush.msk.msra.mxu0 %vm1948_vm4, %v1857_v16  ;;  %v178_v51 = vsub.f32 %v2016_v35, %v177_v43  ;;  %v2059_v52 = vsub.f32 %v1509_v45, %v1509_v45 }
  0x22   :  { %v204_v47 = vand.u32 4294901760, %v203_v38  ;;  %v210_v48 = vand.u32 4294901760, %v209_v39  ;;  %v221_v49 = vsub.f32 %v2006_v32, %v220_v40  ;;  %v232_v50 = vand.u32 4294901760, %v2033_v41 }
  0x23   :  { %1672 = vmatpush.msk.msra.mxu2 %vm1956_vm5, %v1857_v16  ;;  %1520 = vmatpush.msk.msra.mxu0 %vm1956_vm5, %v1857_v16  ;;  %v216_v54 = vand.u32 4294901760, %v215_v42  ;;  %v227_v55 = vsub.f32 %v2018_v36, %v226_v44  ;;  %v1508_v57 = vsel %vm1992_vm8, 1.0, %v1858_v18  ;;  %v238_v59 = vand.u32 4294901760, %v2059_v52  ;;  %v2117_v42 = vld [vmem:[#allocation5] ss:$0 sm:$0xff] }
  0x24   :  { %1676 = vmatpush.msra.mxu3 %v204_v47  ;;  %205 = vmatpush.msra.mxu1 %v204_v47  ;;  %v222_v58 = vand.u32 4294901760, %v221_v49  ;;  %v179_v61 = vand.u32 4294901760, %v178_v51  ;;  %v233_v62 = vsub.f32 %v2033_v41, %v232_v50  ;;  %v2083_v63 = vsub.f32 %v1508_v57, %v1508_v57 }
  0x25   :  { %1673 = vmatpush.msk.msra.mxu2 %vm1964_vm6, %v1857_v16  ;;  %1521 = vmatpush.msk.msra.mxu0 %vm1964_vm6, %v1857_v16  ;;  %v2090_v8 = vsub.f32 %v133_v56, %v2075_v60  ;;  %v228_v19 = vand.u32 4294901760, %v227_v55  ;;  %v239_v21 = vsub.f32 %v2059_v52, %v238_v59  ;;  %v2109_v33 = vsub.f32 %v124_v0, %v2095_v10 }
  0x26   :  { %1677 = vmatpush.msra.mxu3 %v210_v48  ;;  %211 = vmatpush.msra.mxu1 %v210_v48  ;;  %v244_v25 = vand.u32 4294901760, %v2083_v63  ;;  %v234_v37 = vand.u32 4294901760, %v233_v62  ;;  %v2115_v39 = vadd.s32 120, %v1908_v1  ;;  %v127_v45 = vsel %vm122_vm0, %v119_v11, 0 }
  0x27   :  { %1674 = vmatpush.msk.msra.mxu2 %vm1979_vm7, %v1857_v16  ;;  %1522 = vmatpush.msk.msra.mxu0 %vm1979_vm7, %v1857_v16  ;;  %v185_v29 = vand.u32 4294901760, %v2090_v8  ;;  %v161_v47 = vand.u32 4294901760, %v2109_v33  ;;  %v240_v48 = vand.u32 4294901760, %v239_v21  ;;  %v2128_v49 = vadd.s32 112, %v1908_v1 }
  0x28   :  { %1678 = vmatpush.msra.mxu3 %v216_v54  ;;  %217 = vmatpush.msra.mxu1 %v216_v54  ;;  %v245_v38 = vsub.f32 %v2083_v63, %v244_v25  ;;  %v2134_v53 = vand.u32 4294901760, %v127_v45  ;;  %vm490_vm9 = vcmp.eq.s32.totalorder %v2115_v39, %v2117_v42  ;;  %v2152_v56 = vadd.s32 96, %v1908_v1 }
  0x29   :  { %1675 = vmatpush.msk.msra.mxu2 %vm1992_vm8, %v1857_v16  ;;  %1523 = vmatpush.msk.msra.mxu0 %vm1992_vm8, %v1857_v16  ;;  %v186_v46 = vsub.f32 %v2090_v8, %v185_v29  ;;  %v162_v51 = vsub.f32 %v2109_v33, %v161_v47  ;;  %vm489_vm10 = vcmp.eq.s32.totalorder %v2128_v49, %v2117_v42  ;;  %v2187_v0 = vadd.s32 80, %v1908_v1 }
  0x2a   :  { %180 = vmatmul.f32.vlgmr.msra.gmra.mxu2 %v179_v61  ;;  %1679 = vmatpush.msra.mxu3 %v222_v58  ;;  %v246_v55 = vand.u32 4294901760, %v245_v38  ;;  %vm487_vm12 = vcmp.eq.s32.totalorder %v2152_v56, %v2117_v42  ;;  %v2206_v21 = vadd.s32 72, %v1908_v1 }
  0x2b   :  { %275 = vmatpush.msrb.mxu2 %v1974_v22  ;;  %223 = vmatpush.msra.mxu1 %v222_v58  ;;  %v187_v54 = vand.u32 4294901760, %v186_v46  ;;  %v2141_v22 = vadd.s32 104, %v1908_v1  ;;  %vm485_vm14 = vcmp.eq.s32.totalorder %v2187_v0, %v2117_v42 }
  0x2c   :  { %1680 = vmatpush.msra.mxu3 %v228_v19  ;;  %378 = vmatpush.msrb.mxu0 %v202_v30  ;;  %v2145_v30 = vsub.f32 %v127_v45, %v2134_v53  ;;  %v2223_v45 = vadd.s32 64, %v1908_v1  ;;  %vm3255_vm15 = vcmp.eq.s32.totalorder %v2206_v21, %v2117_v42 }
  0x2d   :  { %278 = vmatpush.msrb.mxu2 %v1976_v23  ;;  %229 = vmatpush.msra.mxu1 %v228_v19  ;;  %v163_v23 = vand.u32 4294901760, %v162_v51  ;;  %vm488_vm11 = vcmp.eq.s32.totalorder %v2141_v22, %v2117_v42  ;;  %v1552_v19 = vsel %vm487_vm12, 1.0, %v1858_v18 }
  0x2e   :  { %1681 = vmatpush.msra.mxu3 %v234_v37  ;;  %382 = vmatpush.msrb.mxu0 %v208_v31  ;;  %v1555_v31 = vsel %vm490_vm9, 1.0, %v1858_v18  ;;  %v169_v57 = vand.u32 4294901760, %v2145_v30  ;;  %v1553_v61 = vsel %vm488_vm11, 1.0, %v1858_v18  ;;  %vm3254_vm0 = vcmp.eq.s32.totalorder %v2223_v45, %v2117_v42 }
  0x2f   :  { %281 = vmatpush.msrb.mxu2 %v1989_v26  ;;  %235 = vmatpush.msra.mxu1 %v234_v37  ;;  %v1554_v26 = vsel %vm489_vm10, 1.0, %v1858_v18  ;;  %v2174_v58 = vsub.f32 %v1555_v31, %v1555_v31  ;;  %v2211_v37 = vsub.f32 %v1553_v61, %v1553_v61  ;;  %v1548_v61 = vsel %vm3254_vm0, 1.0, %v1858_v18 }
  0x30   :  { %1682 = vmatpush.msra.mxu3 %v240_v48  ;;  %386 = vmatpush.msrb.mxu0 %v214_v34  ;;  %v2169_v34 = vadd.s32 88, %v1908_v1  ;;  %v170_v62 = vsub.f32 %v2145_v30, %v169_v57  ;;  %v2193_v11 = vsub.f32 %v1554_v26, %v1554_v26  ;;  %v2323_v17 = vsub.f32 %v1548_v61, %v1548_v61 }
  0x31   :  { %284 = vmatpush.msrb.mxu2 %v2006_v32  ;;  %241 = vmatpush.msra.mxu1 %v240_v48  ;;  %v594_v12 = vand.u32 4294901760, %v2174_v58  ;;  %v2229_v32 = vsub.f32 %v1552_v19, %v1552_v19  ;;  %v1550_v48 = vsel %vm485_vm14, 1.0, %v1858_v18  ;;  %v606_v51 = vand.u32 4294901760, %v2211_v37 }
  0x32   :  { %188 = vmatmul.f32.gmra.mxu2 %v187_v54  ;;  %1683 = vmatpush.msra.mxu3 %v246_v55  ;;  %vm486_vm13 = vcmp.eq.s32.totalorder %v2169_v34, %v2117_v42  ;;  %v171_v38 = vand.u32 4294901760, %v170_v62  ;;  %v2284_v15 = vsub.f32 %v1550_v48, %v1550_v48  ;;  %v523_v48 = vld [vmem:[#allocation8] sm:$0xff] }
  0x33   :  { %257 = vmatmul.f32.vlgmr.msra.gmra.mxu3 %v1996_v28  ;;  %287 = vmatpush.msrb.mxu2 %v2018_v36  ;;  %v1551_v13 = vsel %vm486_vm13, 1.0, %v1858_v18  ;;  %v595_v46 = vsub.f32 %v2174_v58, %v594_v12  ;;  %v607_v26 = vsub.f32 %v2211_v37, %v606_v51  ;;  %v2393_v27 = vand.u32 4294901760, %v523_v48 }
  0x34   :  { %1524 = vmatpush.msk.msrb.mxu3 %vm1933_vm1, %v1857_v16  ;;  %247 = vmatpush.msra.mxu1 %v246_v55  ;;  %v2261_v54 = vsub.f32 %v1551_v13, %v1551_v13  ;;  %v1549_v55 = vsel %vm3255_vm15, 1.0, %v1858_v18 }
  0x35   :  { %290 = vmatpush.msrb.mxu2 %v2033_v41  ;;  %164 = vmatmul.f32.vlgmr.msra.gmra.mxu0 %v163_v23  ;;  %v612_v23 = vand.u32 4294901760, %v2229_v32  ;;  %v596_v31 = vand.u32 4294901760, %v595_v46  ;;  %v2305_v36 = vsub.f32 %v1549_v55, %v1549_v55  ;;  %v608_v13 = vand.u32 4294901760, %v607_v26 }
  0x36   :  { %1525 = vmatpush.msk.msrb.mxu3 %vm1938_vm2, %v1857_v16  ;;  %249 = vmatmul.f32.vlgmr.msra.gmra.mxu1 %v2095_v10 }
  0x37   :  { %293 = vmatpush.msrb.mxu2 %v2059_v52  ;;  %1532 = vmatpush.msk.msrb.mxu1 %vm1933_vm1, %v1857_v16  ;;  %vm3256_vm1 = vcmp.eq.s32.totalorder %v1911_v2, %v2117_v42  ;;  %v613_v19 = vsub.f32 %v2229_v32, %v612_v23 }
  0x38   :  { %1526 = vmatpush.msk.msrb.mxu3 %vm1943_vm3, %v1857_v16  ;;  %390 = vmatpush.msrb.mxu0 %v220_v40  ;;  %v600_v40 = vand.u32 4294901760, %v2193_v11 }
  0x39   :  { %296 = vmatpush.msrb.mxu2 %v2083_v63  ;;  %1533 = vmatpush.msk.msrb.mxu1 %vm1938_vm2, %v1857_v16  ;;  %vm3257_vm2 = vcmp.eq.s32.totalorder %v1914_v3, %v2117_v42 }
  0x3a   :  { %1527 = vmatpush.msk.msrb.mxu3 %vm1948_vm4, %v1857_v16  ;;  %299 = vmatmul.f32.vlgmr.msrb.gmra.mxu2 %v2109_v33  ;;  %v601_v14 = vsub.f32 %v2193_v11, %v600_v40  ;;  %v1547_v33 = vsel %vm3256_vm1, 1.0, %v1858_v18  ;;  %v1546_v20 = vsel %vm3257_vm2, 1.0, %v1858_v18 }
  0x3b   :  { %261 = vmatmul.f32.gmra.mxu3 %v2075_v60  ;;  %1556 = vmatpush.msk.msra.mxu2 %vm490_vm9, %v1857_v16  ;;  %v2360_v46 = vsub.f32 %v1547_v33, %v1547_v33  ;;  %v2381_v55 = vsub.f32 %v1546_v20, %v1546_v20 }
  0x3c   :  { %1528 = vmatpush.msk.msrb.mxu3 %vm1956_vm5, %v1857_v16  ;;  %1534 = vmatpush.msk.msrb.mxu1 %vm1943_vm3, %v1857_v16  ;;  %v602_v62 = vand.u32 4294901760, %v601_v14  ;;  %vm3259_vm3 = vcmp.eq.s32.totalorder %v1917_v4, %v2117_v42 }
  0x3d   :  { %1557 = vmatpush.msk.msra.mxu2 %vm489_vm10, %v1857_v16  ;;  %172 = vmatmul.f32.gmra.mxu0 %v171_v38  ;;  %v624_v38 = vand.u32 4294901760, %v2284_v15  ;;  %v1545_v24 = vsel %vm3259_vm3, 1.0, %v1858_v18 }
  0x3e   :  { %1529 = vmatpush.msk.msrb.mxu3 %vm1964_vm6, %v1857_v16  ;;  %1535 = vmatpush.msk.msrb.mxu1 %vm1948_vm4, %v1857_v16  ;;  %vm3258_vm4 = vcmp.eq.s32.totalorder %v1920_v5, %v2117_v42  ;;  %v2398_v26 = vsub.f32 %v1545_v24, %v1545_v24 }
  0x3f   :  { %1558 = vmatpush.msk.msra.mxu2 %vm488_vm11, %v1857_v16  ;;  %253 = vmatmul.f32.gmra.mxu1 %v2134_v53  ;;  %v625_v52 = vsub.f32 %v2284_v15, %v624_v38 }
  0x40   :  { %1530 = vmatpush.msk.msrb.mxu3 %vm1979_vm7, %v1857_v16  ;;  %394 = vmatpush.msrb.mxu0 %v226_v44  ;;  %v618_v44 = vand.u32 4294901760, %v2261_v54  ;;  %v3246_v20 = vand.u32 4294901760, %v2398_v26 }
  0x41   :  { %1559 = vmatpush.msk.msra.mxu2 %vm487_vm12, %v1857_v16  ;;  %1536 = vmatpush.msk.msrb.mxu1 %vm1956_vm5, %v1857_v16  ;;  %vm478_vm5 = vcmp.eq.s32.totalorder %v1923_v6, %v2117_v42 }
  0x42   :  { %1531 = vmatpush.msk.msrb.mxu3 %vm1992_vm8, %v1857_v16  ;;  %304 = vmatmul.f32.gmra.mxu2 %v2145_v30  ;;  %v619_v41 = vsub.f32 %v2261_v54, %v618_v44 }
  0x43   :  { %345 = vmatmul.f32.vlgmr.msrb.gmra.mxu3 %v161_v47  ;;  %1560 = vmatpush.msk.msra.mxu2 %vm486_vm13, %v1857_v16  ;;  %v614_v47 = vand.u32 4294901760, %v613_v19  ;;  %v1543_v19 = vsel %vm478_vm5, 1.0, %v1858_v18 }
  0x44   :  { %597 = vmatpush.msra.mxu3 %v596_v31  ;;  %398 = vmatpush.msrb.mxu0 %v232_v50  ;;  %v630_v50 = vand.u32 4294901760, %v2305_v36  ;;  %v620_v14 = vand.u32 4294901760, %v619_v41  ;;  %v626_v31 = vand.u32 4294901760, %v625_v52  ;;  %v2449_v52 = vsub.f32 %v1543_v19, %v1543_v19 }
  0x45   :  { %1561 = vmatpush.msk.msra.mxu2 %vm485_vm14, %v1857_v16  ;;  %1537 = vmatpush.msk.msrb.mxu1 %vm1964_vm6, %v1857_v16  ;;  %vm477_vm6 = vcmp.eq.s32.totalorder %v1926_v7, %v2117_v42 }
  0x46   :  { %603 = vmatpush.msra.mxu3 %v602_v62  ;;  %402 = vmatpush.msrb.mxu0 %v238_v59  ;;  %v3253_v59 = vand.u32 4294901760, %v2323_v17  ;;  %v631_v63 = vsub.f32 %v2305_v36, %v630_v50  ;;  %v3251_v62 = vand.u32 4294901760, %v2360_v46 }
  0x47   :  { %1562 = vmatpush.msk.msra.mxu2 %vm3255_vm15, %v1857_v16  ;;  %1538 = vmatpush.msk.msrb.mxu1 %vm1979_vm7, %v1857_v16  ;;  %vm476_vm7 = vcmp.eq.s32.totalorder %v1929_v9, %v2117_v42 }
  0x48   :  { %609 = vmatpush.msra.mxu3 %v608_v13  ;;  %406 = vmatpush.msrb.mxu0 %v244_v25  ;;  %v1544_v25 = vsel %vm3258_vm4, 1.0, %v1858_v18  ;;  %v637_v61 = vsub.f32 %v2323_v17, %v3253_v59  ;;  %v632_v30 = vand.u32 4294901760, %v631_v63  ;;  %v2430_v13 = vsub.f32 %v523_v48, %v2393_v27  ;;  %v524_v63 = vld [vmem:[#allocation8 + $0x8] sm:$0xff] }
  0x49   :  { %1563 = vmatpush.msk.msra.mxu2 %vm3254_vm0, %v1857_v16  ;;  %1539 = vmatpush.msk.msrb.mxu1 %vm1992_vm8, %v1857_v16  ;;  %v643_v41 = vsub.f32 %v2360_v46, %v3251_v62  ;;  %vm475_vm8 = vcmp.eq.s32.totalorder %v1908_v1, %v2117_v42  ;;  %v1541_v24 = vsel %vm476_vm7, 1.0, %v1858_v18 }
  0x4a   :  { %615 = vmatpush.msra.mxu3 %v614_v47  ;;  %309 = vmatmul.f32.gmra.mxu2 %v2016_v35  ;;  %v638_v33 = vand.u32 4294901760, %v637_v61  ;;  %v1542_v47 = vsel %vm477_vm6, 1.0, %v1858_v18  ;;  %v1540_v19 = vsel %vm475_vm8, 1.0, %v1858_v18 }
  0x4b   :  { %351 = vmatmul.f32.gmra.mxu3 %v169_v57  ;;  %408 = vmatmul.f32.vlgmr.msrb.gmra.mxu0 %v2095_v10  ;;  %v2412_v57 = vsub.f32 %v1544_v25, %v1544_v25  ;;  %v2470_v25 = vsub.f32 %v1542_v47, %v1542_v47  ;;  %v644_v61 = vand.u32 4294901760, %v643_v41  ;;  %v3248_v41 = vand.u32 4294901760, %v2449_v52 }
  0x4c   :  { %449 = vmatmul.f32.vlgmr.msrb.gmra.mxu1 %v2095_v10  ;;  %1564 = vmatpush.msk.msra.mxu2 %vm3256_vm1, %v1857_v16  ;;  %v3247_v10 = vand.u32 4294901760, %v2381_v55  ;;  %v2491_v47 = vand.u32 4294901760, %v524_v63 }
  0x4d   :  { %621 = vmatpush.msra.mxu3 %v620_v14  ;;  %707 = vmatpush.msra.mxu0 %v2174_v58  ;;  %v3249_v14 = vand.u32 4294901760, %v2412_v57 }
  0x4e   :  { %1572 = vmatpush.msk.msra.mxu1 %vm490_vm9, %v1857_v16  ;;  %1565 = vmatpush.msk.msra.mxu2 %vm3257_vm2, %v1857_v16  ;;  %v649_v48 = vsub.f32 %v2381_v55, %v3247_v10 }
  0x4f   :  { %627 = vmatpush.msra.mxu3 %v626_v31  ;;  %710 = vmatpush.msra.mxu0 %v2193_v11  ;;  %v2473_v31 = vand.u32 4294901760, %v2430_v13  ;;  %v661_v10 = vsub.f32 %v2412_v57, %v3249_v14  ;;  %v525_v14 = vld [vmem:[#allocation8 + $0x10] sm:$0xff]  ;;  %v526_v11 = vld [vmem:[#allocation8 + $0x18] sm:$0xff] }
  0x50   :  { %1573 = vmatpush.msk.msra.mxu1 %vm489_vm10, %v1857_v16  ;;  %1566 = vmatpush.msk.msra.mxu2 %vm3259_vm3, %v1857_v16  ;;  %v2561_v62 = vand.u32 4294901760, %v525_v14 }
  0x51   :  { %633 = vmatpush.msra.mxu3 %v632_v30  ;;  %713 = vmatpush.msra.mxu0 %v2211_v37  ;;  %v655_v30 = vsub.f32 %v2398_v26, %v3246_v20  ;;  %v650_v20 = vand.u32 4294901760, %v649_v48  ;;  %v562_v35 = vsub.f32 %v2430_v13, %v2473_v31 }
  0x52   :  { %1574 = vmatpush.msk.msra.mxu1 %vm488_vm11, %v1857_v16  ;;  %1567 = vmatpush.msk.msra.mxu2 %vm3258_vm4, %v1857_v16 }
  0x53   :  { %639 = vmatpush.msra.mxu3 %v638_v33  ;;  %716 = vmatpush.msra.mxu0 %v2229_v32  ;;  %v2488_v33 = vsub.f32 %v1541_v24, %v1541_v24  ;;  %v2504_v24 = vsub.f32 %v1540_v19, %v1540_v19  ;;  %v656_v48 = vand.u32 4294901760, %v655_v30  ;;  %v662_v30 = vand.u32 4294901760, %v661_v10 }
  0x54   :  { %314 = vmatmul.f32.gmra.mxu2 %v2090_v8  ;;  %1575 = vmatpush.msk.msra.mxu1 %vm487_vm12, %v1857_v16  ;;  %v2583_v8 = vsub.f32 %v525_v14, %v2561_v62  ;;  %v2633_v14 = vand.u32 4294901760, %v526_v11 }
  0x55   :  { %357 = vmatmul.f32.gmra.mxu3 %v177_v43  ;;  %412 = vmatmul.f32.gmra.mxu0 %v2134_v53  ;;  %v3250_v43 = vand.u32 4294901760, %v2470_v25  ;;  %v3252_v19 = vand.u32 4294901760, %v2488_v33 }
  0x56   :  { %453 = vmatmul.f32.gmra.mxu1 %v2134_v53  ;;  %1568 = vmatpush.msk.msra.mxu2 %vm478_vm5, %v1857_v16  ;;  %v667_v53 = vsub.f32 %v2449_v52, %v3248_v41  ;;  %v2534_v41 = vand.u32 4294901760, %v562_v35 }
  0x57   :  { %645 = vmatpush.msra.mxu3 %v644_v61  ;;  %719 = vmatpush.msra.mxu0 %v2261_v54  ;;  %v2523_v61 = vsub.f32 %v524_v63, %v2491_v47  ;;  %v673_v63 = vsub.f32 %v2470_v25, %v3250_v43  ;;  %v679_v35 = vsub.f32 %v2488_v33, %v3252_v19 }
  0x58   :  { %1576 = vmatpush.msk.msra.mxu1 %vm486_vm13, %v1857_v16  ;;  %1569 = vmatpush.msk.msra.mxu2 %vm477_vm6, %v1857_v16  ;;  %v668_v10 = vand.u32 4294901760, %v667_v53 }
  0x59   :  { %651 = vmatpush.msra.mxu3 %v650_v20  ;;  %722 = vmatpush.msra.mxu0 %v2284_v15  ;;  %v684_v20 = vand.u32 4294901760, %v2504_v24  ;;  %v2553_v43 = vand.u32 4294901760, %v2523_v61  ;;  %v674_v53 = vand.u32 4294901760, %v673_v63 }
  0x5a   :  { %1577 = vmatpush.msk.msra.mxu1 %vm485_vm14, %v1857_v16  ;;  %1570 = vmatpush.msk.msra.mxu2 %vm476_vm7, %v1857_v16 }
  0x5b   :  { %657 = vmatpush.msra.mxu3 %v656_v48  ;;  %725 = vmatpush.msra.mxu0 %v2305_v36  ;;  %v2558_v48 = vld [vmem:[%s3241_s2] ss:$0 sm:$0xff]  ;;  %v685_v19 = vsub.f32 %v2504_v24, %v684_v20  ;;  %v570_v59 = vsub.f32 %v2523_v61, %v2553_v43  ;;  %s1859_s2 = smov [#allocation10]  }
  0x5c   :  { %1578 = vmatpush.msk.msra.mxu1 %vm3255_vm15, %v1857_v16  ;;  %1571 = vmatpush.msk.msra.mxu2 %vm475_vm8, %v1857_v16  ;;  %vm3267_vm15 = vcmp.eq.s32.totalorder %v2128_v49, %v2558_v48  ;;  %s1478_s17 = sshll.u32 %s1859_s2, 4  ;;  %s1479_s17 = int_to_ptr.vmem [resolvable:$true] %s1478_s17 }
  0x5d   :  { %663 = vmatpush.msra.mxu3 %v662_v30  ;;  %728 = vmatpush.msra.mxu0 %v2323_v17  ;;  %v680_v30 = vand.u32 4294901760, %v679_v35  ;;  %v2602_v58 = vand.u32 4294901760, %v570_v59 }
  0x5e   :  { %564 = vmatmul.f32.vlgmr.msra.gmra.mxu2 %v2534_v41  ;;  %1579 = vmatpush.msk.msra.mxu1 %vm3254_vm0, %v1857_v16  ;;  %vm978_vm0 = vcmp.eq.s32.totalorder %v2115_v39, %v2558_v48 }
  0x5f   :  { %363 = vmatmul.f32.gmra.mxu3 %v185_v29  ;;  %416 = vmatmul.f32.gmra.mxu0 %v1996_v28  ;;  %v1619_v29 = vsel %vm978_vm0, 1.0, %v1858_v18 }
  0x60   :  { %457 = vmatmul.f32.gmra.mxu1 %v1996_v28  ;;  %669 = vmatpush.msra.mxu3 %v668_v10  ;;  %v686_v28 = vand.u32 4294901760, %v685_v19  ;;  %v2620_v59 = vsub.f32 %v1619_v29, %v1619_v29  ;;  %v2663_v10 = vsub.f32 %v526_v11, %v2633_v14  ;;  %v3289_v29 = vand.u32 4294901760, %v2323_v17 }
  0x61   :  { %731 = vmatpush.msra.mxu0 %v2360_v46  ;;  %834 = vmatpush.msrb.mxu2 %v594_v12  ;;  %v1618_v12 = vsel %vm3267_vm15, 1.0, %v1858_v18 }
  0x62   :  { %1580 = vmatpush.msk.msra.mxu1 %vm3256_vm1, %v1857_v16  ;;  %675 = vmatpush.msra.mxu3 %v674_v53  ;;  %vm3262_vm1 = vcmp.eq.s32.totalorder %v2141_v22, %v2558_v48  ;;  %v2627_v37 = vsub.f32 %v1618_v12, %v1618_v12  ;;  %v1078_v19 = vand.u32 4294901760, %v2620_v59 }
  0x63   :  { %734 = vmatpush.msra.mxu0 %v2381_v55  ;;  %838 = vmatpush.msrb.mxu2 %v600_v40  ;;  %v2614_v40 = vand.u32 4294901760, %v2583_v8 }
  0x64   :  { %1581 = vmatpush.msk.msra.mxu1 %vm3257_vm2, %v1857_v16  ;;  %681 = vmatpush.msra.mxu3 %v680_v30  ;;  %vm3266_vm2 = vcmp.eq.s32.totalorder %v2152_v56, %v2558_v48  ;;  %v1079_v15 = vsub.f32 %v2620_v59, %v1078_v19 }
  0x65   :  { %737 = vmatpush.msra.mxu0 %v2398_v26  ;;  %842 = vmatpush.msrb.mxu2 %v606_v51  ;;  %v1617_v51 = vsel %vm3262_vm1, 1.0, %v1858_v18  ;;  %v578_v32 = vsub.f32 %v2583_v8, %v2614_v40 }
  0x66   :  { %1582 = vmatpush.msk.msra.mxu1 %vm3259_vm3, %v1857_v16  ;;  %687 = vmatpush.msra.mxu3 %v686_v28  ;;  %v2651_v63 = vsub.f32 %v1617_v51, %v1617_v51  ;;  %vm3268_vm3 = vcmp.eq.s32.totalorder %v2187_v0, %v2558_v48  ;;  %v2711_v28 = vand.u32 4294901760, %v2663_v10  ;;  %v1080_v17 = vand.u32 4294901760, %v1079_v15 }
  0x67   :  { %740 = vmatpush.msra.mxu0 %v2412_v57  ;;  %846 = vmatpush.msrb.mxu2 %v612_v23  ;;  %v1616_v23 = vsel %vm3266_vm2, 1.0, %v1858_v18  ;;  %v1614_v53 = vsel %vm3268_vm3, 1.0, %v1858_v18  ;;  %v3290_v15 = vand.u32 4294901760, %v2360_v46 }
  0x68   :  { %572 = vmatmul.f32.gmra.mxu2 %v2602_v58  ;;  %1583 = vmatpush.msk.msra.mxu1 %vm3258_vm4, %v1857_v16  ;;  %vm974_vm4 = vcmp.eq.s32.totalorder %v2169_v34, %v2558_v48  ;;  %v2672_v54 = vsub.f32 %v1616_v23, %v1616_v23  ;;  %v2729_v12 = vsub.f32 %v1614_v53, %v1614_v53  ;;  %v3309_v39 = vand.u32 4294901760, %v2651_v63 }
  0x69   :  { %420 = vmatmul.f32.gmra.mxu0 %v2075_v60  ;;  %461 = vmatmul.f32.gmra.mxu1 %v2075_v60  ;;  %v1084_v60 = vand.u32 4294901760, %v2627_v37  ;;  %v1615_v35 = vsel %vm974_vm4, 1.0, %v1858_v18  ;;  %v586_v23 = vsub.f32 %v2663_v10, %v2711_v28 }
  0x6a   :  { %689 = vmatmul.f32.vlgmr.msra.gmra.mxu3 %v2393_v27  ;;  %743 = vmatpush.msra.mxu0 %v2449_v52  ;;  %v3260_v36 = vand.u32 4294901760, %v2672_v54  ;;  %v3263_v46 = vand.u32 4294901760, %v2729_v12 }
  0x6b   :  { %850 = vmatpush.msrb.mxu2 %v618_v44  ;;  %1588 = vmatpush.msk.msrb.mxu3 %vm490_vm9, %v1857_v16  ;;  %v2680_v44 = vand.u32 4294901760, %v578_v32  ;;  %vm3269_vm9 = vcmp.eq.s32.totalorder %v2206_v21, %v2558_v48  ;;  %v1085_v30 = vsub.f32 %v2627_v37, %v1084_v60 }
  0x6c   :  { %1584 = vmatpush.msk.msra.mxu1 %vm478_vm5, %v1857_v16  ;;  %746 = vmatpush.msra.mxu0 %v2470_v25  ;;  %v1613_v11 = vsel %vm3269_vm9, 1.0, %v1858_v18  ;;  %v1097_v53 = vsub.f32 %v2672_v54, %v3260_v36 }
  0x6d   :  { %854 = vmatpush.msrb.mxu2 %v624_v38  ;;  %1589 = vmatpush.msk.msrb.mxu3 %vm489_vm10, %v1857_v16  ;;  %v3261_v38 = vand.u32 4294901760, %v2651_v63  ;;  %vm971_vm10 = vcmp.eq.s32.totalorder %v2223_v45, %v2558_v48  ;;  %v1086_v32 = vand.u32 4294901760, %v1085_v30  ;;  %v2758_v30 = vsub.f32 %v1613_v11, %v1613_v11 }
  0x6e   :  { %1585 = vmatpush.msk.msra.mxu1 %vm477_vm6, %v1857_v16  ;;  %749 = vmatpush.msra.mxu0 %v2488_v33 }
  0x6f   :  { %858 = vmatpush.msrb.mxu2 %v630_v50  ;;  %1590 = vmatpush.msk.msrb.mxu3 %vm488_vm11, %v1857_v16  ;;  %v2719_v50 = vsub.f32 %v1615_v35, %v1615_v35  ;;  %v1091_v51 = vsub.f32 %v2651_v63, %v3261_v38  ;;  %v1612_v35 = vsel %vm971_vm10, 1.0, %v1858_v18  ;;  %vm970_vm11 = vcmp.eq.s32.totalorder %v1911_v2, %v2558_v48 }
  0x70   :  { %1586 = vmatpush.msk.msra.mxu1 %vm476_vm7, %v1857_v16  ;;  %752 = vmatpush.msra.mxu0 %v2504_v24  ;;  %v2773_v36 = vsub.f32 %v1612_v35, %v1612_v35  ;;  %v1098_v35 = vand.u32 4294901760, %v1097_v53  ;;  %v3265_v38 = vand.u32 4294901760, %v2758_v30 }
  0x71   :  { %862 = vmatpush.msrb.mxu2 %v3289_v29  ;;  %1591 = vmatpush.msk.msrb.mxu3 %vm487_vm12, %v1857_v16  ;;  %v3264_v29 = vand.u32 4294901760, %v2719_v50  ;;  %v1092_v11 = vand.u32 4294901760, %v1091_v51  ;;  %vm969_vm12 = vcmp.eq.s32.totalorder %v1914_v3, %v2558_v48  ;;  %v3292_v51 = vand.u32 4294901760, %v2398_v26 }
  0x72   :  { %580 = vmatmul.f32.gmra.mxu2 %v2680_v44  ;;  %1587 = vmatpush.msk.msra.mxu1 %vm475_vm8, %v1857_v16  ;;  %v1109_v26 = vsub.f32 %v2729_v12, %v3263_v46  ;;  %v1120_v53 = vand.u32 4294901760, %v2773_v36 }
  0x73   :  { %693 = vmatmul.f32.gmra.mxu3 %v2491_v47  ;;  %755 = vmatmul.f32.vlgmr.msra.gmra.mxu0 %v2430_v13 }
  0x74   :  { %809 = vmatmul.f32.vlgmr.msra.gmra.mxu1 %v2473_v31  ;;  %866 = vmatpush.msrb.mxu2 %v3290_v15  ;;  %v3291_v15 = vand.u32 4294901760, %v2381_v55  ;;  %v1611_v55 = vsel %vm970_vm11, 1.0, %v1858_v18  ;;  %v1110_v46 = vand.u32 4294901760, %v1109_v26 }
  0x75   :  { %1592 = vmatpush.msk.msrb.mxu3 %vm486_vm13, %v1857_v16  ;;  %1620 = vmatpush.msk.msrb.mxu0 %vm978_vm0, %v1857_v16  ;;  %vm968_vm13 = vcmp.eq.s32.totalorder %v1917_v4, %v2558_v48 }
  0x76   :  { %1081 = vmatpush.msrb.mxu1 %v1080_v17  ;;  %870 = vmatpush.msrb.mxu2 %v3291_v15  ;;  %v2785_v17 = vand.u32 4294901760, %v586_v23  ;;  %v1103_v15 = vsub.f32 %v2719_v50, %v3264_v29  ;;  %v3294_v23 = vand.u32 4294901760, %v2412_v57  ;;  %v1609_v57 = vsel %vm968_vm13, 1.0, %v1858_v18 }
  0x77   :  { %1593 = vmatpush.msk.msrb.mxu3 %vm485_vm14, %v1857_v16  ;;  %1621 = vmatpush.msk.msrb.mxu0 %vm3267_vm15, %v1857_v16  ;;  %vm3293_vm14 = vcmp.eq.s32.totalorder %v2206_v21, %v2117_v42  ;;  %vm965_vm15 = vcmp.eq.s32.totalorder %v1926_v7, %v2558_v48 }
  0x78   :  { %1087 = vmatpush.msrb.mxu1 %v1086_v32  ;;  %874 = vmatpush.msrb.mxu2 %v3292_v51  ;;  %v1610_v32 = vsel %vm969_vm12, 1.0, %v1858_v18  ;;  %v2817_v51 = vsub.f32 %v1611_v55, %v1611_v55  ;;  %v1115_v55 = vsub.f32 %v2758_v30, %v3265_v38  ;;  %v2852_v38 = vsub.f32 %v1609_v57, %v1609_v57 }
  0x79   :  { %1594 = vmatpush.msk.msrb.mxu3 %vm3293_vm14, %v1857_v16  ;;  %1622 = vmatpush.msk.msrb.mxu0 %vm3262_vm1, %v1857_v16  ;;  %vm967_vm14 = vcmp.eq.s32.totalorder %v1920_v5, %v2558_v48  ;;  %vm3295_vm1 = vcmp.eq.s32.totalorder %v2223_v45, %v2117_v42 }
  0x7a   :  { %1093 = vmatpush.msrb.mxu1 %v1092_v11  ;;  %878 = vmatpush.msrb.mxu2 %v3294_v23  ;;  %v1104_v11 = vand.u32 4294901760, %v1103_v15  ;;  %v2837_v23 = vsub.f32 %v1610_v32, %v1610_v32  ;;  %v1608_v29 = vsel %vm967_vm14, 1.0, %v1858_v18  ;;  %v1121_v15 = vsub.f32 %v2773_v36, %v1120_v53 }
  0x7b   :  { %1595 = vmatpush.msk.msrb.mxu3 %vm3295_vm1, %v1857_v16  ;;  %1623 = vmatpush.msk.msrb.mxu0 %vm3266_vm2, %v1857_v16  ;;  %v1126_v32 = vand.u32 4294901760, %v2817_v51  ;;  %vm966_vm1 = vcmp.eq.s32.totalorder %v1923_v6, %v2558_v48  ;;  %vm3297_vm2 = vcmp.eq.s32.totalorder %v1911_v2, %v2117_v42  ;;  %v1116_v26 = vand.u32 4294901760, %v1115_v55 }
  0x7c   :  { %588 = vmatmul.f32.gmra.mxu2 %v2785_v17  ;;  %1099 = vmatpush.msrb.mxu1 %v1098_v35  ;;  %v3296_v35 = vand.u32 4294901760, %v2449_v52  ;;  %v3298_v52 = vand.u32 4294901760, %v2470_v25  ;;  %v3270_v57 = vand.u32 4294901760, %v2837_v23  ;;  %v1607_v25 = vsel %vm966_vm1, 1.0, %v1858_v18 }
  0x7d   :  { %697 = vmatmul.f32.gmra.mxu3 %v2561_v62  ;;  %760 = vmatmul.f32.gmra.mxu0 %v2523_v61  ;;  %v1127_v55 = vsub.f32 %v2817_v51, %v1126_v32  ;;  %v3319_v45 = vand.u32 4294901760, %v2852_v38 }
  0x7e   :  { %815 = vmatmul.f32.gmra.mxu1 %v2553_v43  ;;  %882 = vmatpush.msrb.mxu2 %v3296_v35  ;;  %v2867_v35 = vsub.f32 %v1608_v29, %v1608_v29  ;;  %v3300_v29 = vand.u32 4294901760, %v2488_v33  ;;  %v1606_v33 = vsel %vm965_vm15, 1.0, %v1858_v18 }
  0x7f   :  { %1596 = vmatpush.msk.msrb.mxu3 %vm3297_vm2, %v1857_v16  ;;  %1624 = vmatpush.msk.msrb.mxu0 %vm974_vm4, %v1857_v16  ;;  %vm3299_vm2 = vcmp.eq.s32.totalorder %v1914_v3, %v2117_v42 }
  0x80   :  { %1105 = vmatpush.msrb.mxu1 %v1104_v11  ;;  %886 = vmatpush.msrb.mxu2 %v3298_v52  ;;  %v1122_v11 = vand.u32 4294901760, %v1121_v15  ;;  %v3271_v52 = vand.u32 4294901760, %v2852_v38  ;;  %v3272_v15 = vand.u32 4294901760, %v2867_v35  ;;  %v3320_v2 = vand.u32 4294901760, %v2867_v35 }
  0x81   :  { %1597 = vmatpush.msk.msrb.mxu3 %vm3299_vm2, %v1857_v16  ;;  %1625 = vmatpush.msk.msrb.mxu0 %vm3268_vm3, %v1857_v16  ;;  %vm964_vm2 = vcmp.eq.s32.totalorder %v1929_v9, %v2558_v48  ;;  %vm3301_vm3 = vcmp.eq.s32.totalorder %v1917_v4, %v2117_v42 }
  0x82   :  { %1111 = vmatpush.msrb.mxu1 %v1110_v46  ;;  %890 = vmatpush.msrb.mxu2 %v3300_v29  ;;  %v1133_v46 = vsub.f32 %v2837_v23, %v3270_v57  ;;  %v2909_v29 = vsub.f32 %v1607_v25, %v1607_v25  ;;  %v1605_v24 = vsel %vm964_vm2, 1.0, %v1858_v18  ;;  %v2929_v25 = vsub.f32 %v1606_v33, %v1606_v33 }
  0x83   :  { %1598 = vmatpush.msk.msrb.mxu3 %vm3301_vm3, %v1857_v16  ;;  %1626 = vmatpush.msk.msrb.mxu0 %vm3269_vm9, %v1857_v16  ;;  %vm963_vm3 = vcmp.eq.s32.totalorder %v1908_v1, %v2558_v48  ;;  %vm3302_vm9 = vcmp.eq.s32.totalorder %v1920_v5, %v2117_v42 }
  0x84   :  { %1117 = vmatpush.msrb.mxu1 %v1116_v26  ;;  %894 = vmatpush.msrb.mxu2 %v684_v20  ;;  %v1128_v20 = vand.u32 4294901760, %v1127_v55  ;;  %v1139_v26 = vsub.f32 %v2852_v38, %v3271_v52  ;;  %v1604_v57 = vsel %vm963_vm3, 1.0, %v1858_v18  ;;  %v1145_v55 = vsub.f32 %v2867_v35, %v3272_v15 }
  0x85   :  { %1599 = vmatpush.msk.msrb.mxu3 %vm3302_vm9, %v1857_v16  ;;  %1627 = vmatpush.msk.msrb.mxu0 %vm971_vm10, %v1857_v16  ;;  %v1150_v33 = vand.u32 4294901760, %v2909_v29  ;;  %v2946_v52 = vsub.f32 %v1605_v24, %v1605_v24  ;;  %v2958_v15 = vsub.f32 %v1604_v57, %v1604_v57 }
  0x86   :  { %896 = vmatmul.f32.vlgmr.msrb.gmra.mxu2 %v2393_v27  ;;  %1123 = vmatpush.msrb.mxu1 %v1122_v11  ;;  %v1134_v11 = vand.u32 4294901760, %v1133_v46  ;;  %v1140_v18 = vand.u32 4294901760, %v1139_v26  ;;  %v1156_v46 = vand.u32 4294901760, %v2929_v25  ;;  %v1146_v24 = vand.u32 4294901760, %v1145_v55 }
  0x87   :  { %701 = vmatmul.f32.gmra.mxu3 %v2633_v14  ;;  %765 = vmatmul.f32.gmra.mxu0 %v2583_v8  ;;  %v1162_v57 = vand.u32 4294901760, %v2946_v52 }
  0x88   :  { %821 = vmatmul.f32.gmra.mxu1 %v2614_v40  ;;  %1600 = vmatpush.msk.msrb.mxu3 %vm478_vm5, %v1857_v16  ;;  %v1157_v26 = vsub.f32 %v2929_v25, %v1156_v46  ;;  %vm3303_vm5 = vcmp.eq.s32.totalorder %v2128_v49, %v2558_v48  ;;  %v3311_v49 = vand.u32 4294901760, %v2672_v54 }
  0x89   :  { %1628 = vmatpush.msk.msrb.mxu0 %vm970_vm11, %v1857_v16  ;;  %1191 = vmatpush.msra.mxu2 %v2620_v59  ;;  %v1163_v42 = vsub.f32 %v2946_v52, %v1162_v57  ;;  %vm3307_vm9 = vmmov %vm3303_vm5 }
  0x8a   :  { %1129 = vmatpush.msrb.mxu1 %v1128_v20  ;;  %1601 = vmatpush.msk.msrb.mxu3 %vm477_vm6, %v1857_v16  ;;  %v1151_v20 = vsub.f32 %v2909_v29, %v1150_v33  ;;  %vm3304_vm6 = vcmp.eq.s32.totalorder %v2141_v22, %v2558_v48  ;;  %v3312_v22 = vand.u32 4294901760, %v2719_v50 }
  0x8b   :  { %1629 = vmatpush.msk.msrb.mxu0 %vm969_vm12, %v1857_v16  ;;  %1194 = vmatpush.msra.mxu2 %v2627_v37 }
  0x8c   :  { %1135 = vmatpush.msrb.mxu1 %v1134_v11  ;;  %1602 = vmatpush.msk.msrb.mxu3 %vm476_vm7, %v1857_v16  ;;  %v1168_v11 = vand.u32 4294901760, %v2958_v15  ;;  %v1152_v55 = vand.u32 4294901760, %v1151_v20  ;;  %v1164_v20 = vand.u32 4294901760, %v1163_v42  ;;  %vm3305_vm7 = vcmp.eq.s32.totalorder %v2152_v56, %v2558_v48 }
  0x8d   :  { %1630 = vmatpush.msk.msrb.mxu0 %vm968_vm13, %v1857_v16  ;;  %1197 = vmatpush.msra.mxu2 %v2651_v63  ;;  %v3315_v56 = vand.u32 4294901760, %v2758_v30 }
  0x8e   :  { %1141 = vmatpush.msrb.mxu1 %v1140_v18  ;;  %1603 = vmatpush.msk.msrb.mxu3 %vm475_vm8, %v1857_v16  ;;  %v1158_v18 = vand.u32 4294901760, %v1157_v26  ;;  %vm3306_vm8 = vcmp.eq.s32.totalorder %v2187_v0, %v2558_v48  ;;  %v3318_v0 = vand.u32 4294901760, %v2837_v23 }
  0x8f   :  { %1631 = vmatpush.msk.msrb.mxu0 %vm967_vm14, %v1857_v16  ;;  %1200 = vmatpush.msra.mxu2 %v2672_v54 }
  0x90   :  { %900 = vmatmul.f32.gmra.mxu2 %v2491_v47  ;;  %1147 = vmatpush.msrb.mxu1 %v1146_v24  ;;  %v1169_v24 = vsub.f32 %v2958_v15, %v1168_v11 }
  0x91   :  { %770 = vmatmul.f32.gmra.mxu0 %v2663_v10  ;;  %827 = vmatmul.f32.gmra.mxu1 %v2711_v28 }
  0x92   :  { %945 = vmatmul.f32.vlgmr.msrb.gmra.mxu3 %v2393_v27  ;;  %1632 = vmatpush.msk.msrb.mxu0 %vm966_vm1, %v1857_v16  ;;  %v1170_v26 = vand.u32 4294901760, %v1169_v24 }
  0x93   :  { %1203 = vmatpush.msra.mxu2 %v2719_v50  ;;  %1636 = vmatpush.msk.msra.mxu3 %vm978_vm0, %v1857_v16 }
  0x94   :  { %1153 = vmatpush.msrb.mxu1 %v1152_v55  ;;  %1633 = vmatpush.msk.msrb.mxu0 %vm965_vm15, %v1857_v16 }
  0x95   :  { %1206 = vmatpush.msra.mxu2 %v2729_v12  ;;  %1637 = vmatpush.msk.msra.mxu3 %vm3303_vm5, %v1857_v16  ;;  %vm3308_vm5 = vcmp.eq.s32.totalorder %v2206_v21, %v2558_v48 }
  0x96   :  { %1159 = vmatpush.msrb.mxu1 %v1158_v18  ;;  %1634 = vmatpush.msk.msrb.mxu0 %vm964_vm2, %v1857_v16 }
  0x97   :  { %1209 = vmatpush.msra.mxu2 %v2758_v30  ;;  %1638 = vmatpush.msk.msra.mxu3 %vm3304_vm6, %v1857_v16 }
  0x98   :  { %1165 = vmatpush.msrb.mxu1 %v1164_v20  ;;  %1635 = vmatpush.msk.msrb.mxu0 %vm963_vm3, %v1857_v16 }
  0x99   :  { %1212 = vmatpush.msra.mxu2 %v2773_v36  ;;  %1639 = vmatpush.msk.msra.mxu3 %vm3305_vm7, %v1857_v16 }
  0x9a   :  { %904 = vmatmul.f32.gmra.mxu2 %v2561_v62  ;;  %1171 = vmatpush.msrb.mxu1 %v1170_v26 }
  0x9b   :  { %949 = vmatmul.f32.gmra.mxu3 %v2491_v47  ;;  %1048 = vmatmul.f32.vlgmr.msrb.gmra.mxu0 %v2534_v41  ;;  %v3314_v41 = vand.u32 4294901760, %v2729_v12 }
  0x9c   :  { %1173 = vmatmul.f32.vlgmr.msrb.gmra.mxu1 %v2393_v27  ;;  %1215 = vmatpush.msra.mxu2 %v2817_v51 }
  0x9d   :  { %1640 = vmatpush.msk.msra.mxu3 %vm974_vm4, %v1857_v16  ;;  %1318 = vmatpush.msra.mxu0 %v1078_v19 }
  0x9e   :  { %1218 = vmatpush.msra.mxu2 %v2837_v23  ;;  %1652 = vmatpush.msk.msra.mxu1 %vm978_vm0, %v1857_v16  ;;  %vm3310_vm0 = vmmov %vm3304_vm6 }
  0x9f   :  { %1641 = vmatpush.msk.msra.mxu3 %vm3306_vm8, %v1857_v16  ;;  %1322 = vmatpush.msra.mxu0 %v1084_v60  ;;  %vm3313_vm6 = vmmov %vm3305_vm7 }
  0xa0   :  { %1221 = vmatpush.msra.mxu2 %v2852_v38  ;;  %1653 = vmatpush.msk.msra.mxu1 %vm3307_vm9, %v1857_v16  ;;  %vm3316_vm7 = vmmov %vm3306_vm8 }
  0xa1   :  { %1642 = vmatpush.msk.msra.mxu3 %vm3308_vm5, %v1857_v16  ;;  %1326 = vmatpush.msra.mxu0 %v3309_v39 }
  0xa2   :  { %1224 = vmatpush.msra.mxu2 %v2867_v35  ;;  %1654 = vmatpush.msk.msra.mxu1 %vm3310_vm0, %v1857_v16 }
  0xa3   :  { %1643 = vmatpush.msk.msra.mxu3 %vm971_vm10, %v1857_v16  ;;  %1330 = vmatpush.msra.mxu0 %v3311_v49 }
  0xa4   :  { %908 = vmatmul.f32.gmra.mxu2 %v2633_v14  ;;  %953 = vmatmul.f32.gmra.mxu3 %v2561_v62 }
  0xa5   :  { %1056 = vmatmul.f32.gmra.mxu0 %v2602_v58  ;;  %1177 = vmatmul.f32.gmra.mxu1 %v2491_v47 }
  0xa6   :  { %1227 = vmatpush.msra.mxu2 %v2909_v29  ;;  %1644 = vmatpush.msk.msra.mxu3 %vm970_vm11, %v1857_v16 }
  0xa7   :  { %1334 = vmatpush.msra.mxu0 %v3312_v22  ;;  %1655 = vmatpush.msk.msra.mxu1 %vm3313_vm6, %v1857_v16 }
  0xa8   :  { %1230 = vmatpush.msra.mxu2 %v2929_v25  ;;  %1645 = vmatpush.msk.msra.mxu3 %vm969_vm12, %v1857_v16 }
  0xa9   :  { %1338 = vmatpush.msra.mxu0 %v3314_v41  ;;  %1656 = vmatpush.msk.msra.mxu1 %vm974_vm4, %v1857_v16  ;;  %vm3317_vm4 = vmmov %vm3308_vm5 }
  0xaa   :  { %1233 = vmatpush.msra.mxu2 %v2946_v52  ;;  %1646 = vmatpush.msk.msra.mxu3 %vm968_vm13, %v1857_v16 }
  0xab   :  { %1342 = vmatpush.msra.mxu0 %v3315_v56  ;;  %1657 = vmatpush.msk.msra.mxu1 %vm3316_vm7, %v1857_v16 }
  0xac   :  { %1236 = vmatpush.msra.mxu2 %v2958_v15  ;;  %1647 = vmatpush.msk.msra.mxu3 %vm967_vm14, %v1857_v16 }
  0xad   :  { %1346 = vmatpush.msra.mxu0 %v1120_v53  ;;  %1658 = vmatpush.msk.msra.mxu1 %vm3317_vm4, %v1857_v16  ;;  %v181_v34 = vpop.f32.mrf.mxu2 }
  0xae   :  { %1239 = vmatmul.f32.vlgmr.msra.gmra.mxu2 %v2430_v13  ;;  %957 = vmatmul.f32.gmra.mxu3 %v2633_v14 }
  0xaf   :  { %1064 = vmatmul.f32.gmra.mxu0 %v2680_v44  ;;  %1181 = vmatmul.f32.gmra.mxu1 %v2561_v62 }
  0xb0   :  { %1648 = vmatpush.msk.msra.mxu3 %vm966_vm1, %v1857_v16  ;;  %1350 = vmatpush.msra.mxu0 %v1126_v32 }
  0xb1   :  { %1659 = vmatpush.msk.msra.mxu1 %vm971_vm10, %v1857_v16 }
  0xb2   :  { %1649 = vmatpush.msk.msra.mxu3 %vm965_vm15, %v1857_v16  ;;  %1354 = vmatpush.msra.mxu0 %v3318_v0  ;;  %v165_v21 = vpop.f32.mrf.mxu0 }
  0xb3   :  { %1660 = vmatpush.msk.msra.mxu1 %vm970_vm11, %v1857_v16  ;;  %v250_v13 = vpop.f32.mrf.mxu1 }
  0xb4   :  { %1650 = vmatpush.msk.msra.mxu3 %vm964_vm2, %v1857_v16  ;;  %1358 = vmatpush.msra.mxu0 %v3319_v45  ;;  %v251_v58 = vadd.f32 %v250_v13, %v165_v21 }
  0xb5   :  { %1661 = vmatpush.msk.msra.mxu1 %vm969_vm12, %v1857_v16  ;;  %v189_v59 = vpop.f32.mrf.mxu2 }
  0xb6   :  { %1651 = vmatpush.msk.msra.mxu3 %vm963_vm3, %v1857_v16  ;;  %1362 = vmatpush.msra.mxu0 %v3320_v2  ;;  %v258_v37 = vpop.f32.mrf.mxu3 }
  0xb7   :  { %1662 = vmatpush.msk.msra.mxu1 %vm968_vm13, %v1857_v16  ;;  %1244 = vmatmul.f32.gmra.mxu2 %v2523_v61  ;;  %v259_v19 = vadd.f32 %v258_v37, %v181_v34 }
  0xb8   :  { %1072 = vmatmul.f32.gmra.mxu0 %v2785_v17  ;;  %1185 = vmatmul.f32.gmra.mxu1 %v2633_v14 }
  0xb9   :  { %1293 = vmatmul.f32.vlgmr.msra.gmra.mxu3 %v2473_v31  ;;  %1366 = vmatpush.msra.mxu0 %v1150_v33 }
  0xba   :  { %1663 = vmatpush.msk.msra.mxu1 %vm967_vm14, %v1857_v16  ;;  %v173_v3 = vpop.f32.mrf.mxu0 }
  0xbb   :  { %1370 = vmatpush.msra.mxu0 %v1156_v46 }
  0xbc   :  { %1664 = vmatpush.msk.msra.mxu1 %vm966_vm1, %v1857_v16  ;;  %v254_v4 = vpop.f32.mrf.mxu1 }
  0xbd   :  { %1374 = vmatpush.msra.mxu0 %v1162_v57  ;;  %v300_v31 = vpop.f32.mrf.mxu2  ;;  %v255_v61 = vadd.f32 %v254_v4, %v173_v3 }
  0xbe   :  { %1665 = vmatpush.msk.msra.mxu1 %vm965_vm15, %v1857_v16  ;;  %v301_v5 = vadd.f32 %v300_v31, %v251_v58  ;;  %v262_v63 = vpop.f32.mrf.mxu3 }
  0xbf   :  { %1378 = vmatpush.msra.mxu0 %v1168_v11  ;;  %1249 = vmatmul.f32.gmra.mxu2 %v2583_v8  ;;  %v3198_v6 = vadd.f32 %v262_v63, %v189_v59 }
  0xc0   :  { %1666 = vmatpush.msk.msra.mxu1 %vm964_vm2, %v1857_v16  ;;  %1380 = vmatmul.f32.vlgmr.msra.gmra.mxu0 %v2393_v27 }
  0xc1   :  { %1299 = vmatmul.f32.gmra.mxu3 %v2553_v43 }
  0xc2   :  { %1667 = vmatpush.msk.msra.mxu1 %vm963_vm3, %v1857_v16 }
  0xc3   :  { %1429 = vmatmul.f32.vlgmr.msra.gmra.mxu1 %v2393_v27 }
  0xc5   :  { %v305_v7 = vpop.f32.mrf.mxu2 }
  0xc6   :  { %v306_v8 = vadd.f32 %v305_v7, %v255_v61  ;;  %v346_v60 = vpop.f32.mrf.mxu3 }
  0xc7   :  { %1254 = vmatmul.f32.gmra.mxu2 %v2663_v10  ;;  %v347_v54 = vadd.f32 %v346_v60, %v301_v5 }
  0xc8   :  { %1384 = vmatmul.f32.gmra.mxu0 %v2491_v47  ;;  %v409_v9 = vpop.f32.mrf.mxu0 }
  0xc9   :  { %1305 = vmatmul.f32.gmra.mxu3 %v2614_v40  ;;  %v410_v44 = vadd.f32 %v409_v9, %v347_v54  ;;  %v450_v43 = vpop.f32.mrf.mxu1 }
  0xcb   :  { %1433 = vmatmul.f32.gmra.mxu1 %v2491_v47  ;;  %v3215_v38 = vadd.f32 %v450_v43, %v410_v44 }
  0xcd   :  { %v310_v1 = vpop.f32.mrf.mxu2 }
  0xce   :  { %v311_v16 = vadd.f32 %v310_v1, %v259_v19  ;;  %v352_v27 = vpop.f32.mrf.mxu3 }
  0xcf   :  { %v353_v48 = vadd.f32 %v352_v27, %v306_v8 }
  0xd0   :  { %1388 = vmatmul.f32.gmra.mxu0 %v2561_v62 }
  0xd1   :  { %1311 = vmatmul.f32.gmra.mxu3 %v2711_v28 }
  0xd2   :  { %v413_v10 = vpop.f32.mrf.mxu0 }
  0xd3   :  { %1437 = vmatmul.f32.gmra.mxu1 %v2561_v62  ;;  %v414_v36 = vadd.f32 %v413_v10, %v353_v48  ;;  %v454_v50 = vpop.f32.mrf.mxu1 }
  0xd5   :  { %v3220_v40 = vadd.f32 %v454_v50, %v414_v36 }
  0xd7   :  { %v315_v47 = vpop.f32.mrf.mxu2 }
  0xd8   :  { %1392 = vmatmul.f32.gmra.mxu0 %v2633_v14  ;;  %v358_v12 = vpop.f32.mrf.mxu3  ;;  %v316_v43 = vadd.f32 %v315_v47, %v3198_v6 }
  0xd9   :  { %v359_v30 = vadd.f32 %v358_v12, %v311_v16 }
  0xdb   :  { %1441 = vmatmul.f32.gmra.mxu1 %v2633_v14 }
  0xdc   :  { %v417_v17 = vpop.f32.mrf.mxu0 }
  0xdd   :  { %v458_v53 = vpop.f32.mrf.mxu1  ;;  %v418_v7 = vadd.f32 %v417_v17, %v359_v30 }
  0xdf   :  { %v3227_v1 = vadd.f32 %v458_v53, %v418_v7 }
  0xe1   :  { %v565_v51 = vpop.f32.mrf.mxu2 }
  0xe2   :  { %v364_v23 = vpop.f32.mrf.mxu3 }
  0xe3   :  { %v365_v48 = vadd.f32 %v364_v23, %v316_v43 }
  0xe6   :  { %v421_v32 = vpop.f32.mrf.mxu0  ;;  %v462_v28 = vpop.f32.mrf.mxu1 }
  0xeb   :  { %v573_v35 = vpop.f32.mrf.mxu2 }
  0xed   :  { %v690_v52 = vpop.f32.mrf.mxu3 }
  0xee   :  { %v691_v26 = vadd.f32 %v690_v52, %v565_v51  ;;  %v422_v51 = vadd.f32 %v421_v32, %v365_v48 }
  0xf0   :  { %v756_v62 = vpop.f32.mrf.mxu0 }
  0xf1   :  { %v810_v15 = vpop.f32.mrf.mxu1  ;;  %v757_v22 = vadd.f32 %v756_v62, %v691_v26  ;;  %v463_v62 = vadd.f32 %v462_v28, %v422_v51 }
  0xf3   :  { %v811_v0 = vadd.f32 %v810_v15, %v757_v22 }
  0xf5   :  { %v581_v29 = vpop.f32.mrf.mxu2 }
  0xf6   :  { %v694_v25 = vpop.f32.mrf.mxu3 }
  0xf7   :  { %v695_v39 = vadd.f32 %v694_v25, %v573_v35 }
  0xfa   :  { %v761_v33 = vpop.f32.mrf.mxu0 }
  0xfb   :  { %v816_v46 = vpop.f32.mrf.mxu1  ;;  %v762_v56 = vadd.f32 %v761_v33, %v695_v39 }
  0xfd   :  { %v817_v13 = vadd.f32 %v816_v46, %v762_v56 }
  0xff   :  { %v589_v57 = vpop.f32.mrf.mxu2 }
 0x100   :  { %v698_v11 = vpop.f32.mrf.mxu3 }
 0x101   :  { %v699_v58 = vadd.f32 %v698_v11, %v581_v29 }
 0x104   :  { %v766_v55 = vpop.f32.mrf.mxu0 }
 0x105   :  { %v822_v42 = vpop.f32.mrf.mxu1  ;;  %v767_v4 = vadd.f32 %v766_v55, %v699_v58 }
 0x107   :  { %v823_v8 = vadd.f32 %v822_v42, %v767_v4 }
 0x109   :  { %v897_v18 = vpop.f32.mrf.mxu2 }
 0x10a   :  { %v702_v14 = vpop.f32.mrf.mxu3  ;;  %v898_v45 = vadd.f32 %v897_v18, %v811_v0 }
 0x10b   :  { %v703_v54 = vadd.f32 %v702_v14, %v589_v57 }
 0x10e   :  { %v771_v24 = vpop.f32.mrf.mxu0  ;;  %v828_v20 = vpop.f32.mrf.mxu1 }
 0x10f   :  { %v772_v10 = vadd.f32 %v771_v24, %v703_v54 }
 0x111   :  { %v829_v35 = vadd.f32 %v828_v20, %v772_v10 }
 0x113   :  { %v901_v49 = vpop.f32.mrf.mxu2 }
 0x114   :  { %v902_v59 = vadd.f32 %v901_v49, %v817_v13 }
 0x115   :  { %v946_v41 = vpop.f32.mrf.mxu3 }
 0x116   :  { %v947_v2 = vadd.f32 %v946_v41, %v898_v45 }
 0x118   :  { %v1049_v34 = vpop.f32.mrf.mxu0  ;;  %v1445_v31 = vmul.f32 %v947_v2, %v3215_v38 }
 0x119   :  { %v1174_v21 = vpop.f32.mrf.mxu1 }
 0x11a   :  { %v1175_v23 = vadd.f32 %v1174_v21, %v1049_v34 }
 0x11d   :  { %v905_v37 = vpop.f32.mrf.mxu2 }
 0x11e   :  { %v950_v19 = vpop.f32.mrf.mxu3  ;;  %v906_v9 = vadd.f32 %v905_v37, %v823_v8 }
 0x11f   :  { %v951_v3 = vadd.f32 %v950_v19, %v902_v59 }
 0x121   :  { %v1446_v61 = vmul.f32 %v951_v3, %v3220_v40 }
 0x122   :  { %v1057_v5 = vpop.f32.mrf.mxu0  ;;  %v1178_v60 = vpop.f32.mrf.mxu1 }
 0x123   :  { %v1449_v63 = vadd.f32 %v1446_v61, %v1445_v31  ;;  %v1179_v20 = vadd.f32 %v1178_v60, %v1057_v5 }
 0x127   :  { %v954_v44 = vpop.f32.mrf.mxu3  ;;  %v909_v16 = vpop.f32.mrf.mxu2 }
 0x128   :  { %v955_v27 = vadd.f32 %v954_v44, %v906_v9  ;;  %v910_v17 = vadd.f32 %v909_v16, %v829_v35 }
 0x12a   :  { %v1447_v36 = vmul.f32 %v955_v27, %v3227_v1 }
 0x12c   :  { %v1450_v50 = vadd.f32 %v1449_v63, %v1447_v36  ;;  %v1065_v12 = vpop.f32.mrf.mxu0  ;;  %v1182_v30 = vpop.f32.mrf.mxu1 }
 0x12d   :  { %v1183_v45 = vadd.f32 %v1182_v30, %v1065_v12 }
 0x131   :  { %v958_v52 = vpop.f32.mrf.mxu3  ;;  %v1240_v15 = vpop.f32.mrf.mxu2 }
 0x132   :  { %v959_v29 = vadd.f32 %v958_v52, %v910_v17  ;;  %v1241_v42 = vadd.f32 %v1240_v15, %v1175_v23 }
 0x134   :  { %v1448_v25 = vmul.f32 %v959_v29, %v463_v62 }
 0x135   :  { %v1073_v6 = vpop.f32.mrf.mxu0  ;;  %v1186_v33 = vpop.f32.mrf.mxu1 }
 0x136   :  { %v1451_v47 = vadd.f32 %v1450_v50, %v1448_v25  ;;  %v1187_v7 = vadd.f32 %v1186_v33, %v1073_v6 }
 0x138   :  { %v1452_v53 = vrot.slane %v1451_v47, 4 }
 0x13a   :  { %v1453_v46 = vadd.f32 %v1452_v53, %v1451_v47  ;;  %v1245_v11 = vpop.f32.mrf.mxu2 }
 0x13b   :  { %v1246_v39 = vadd.f32 %v1245_v11, %v1179_v20 }
 0x13c   :  { %v1454_v57 = vrot.slane %v1453_v46, 2  ;;  %v1294_v55 = vpop.f32.mrf.mxu3 }
 0x13d   :  { %v1381_v18 = vpop.f32.mrf.mxu0  ;;  %v1295_v14 = vadd.f32 %v1294_v55, %v1241_v42 }
 0x13e   :  { %v1455_v32 = vadd.f32 %v1454_v57, %v1453_v46 }
 0x13f   :  { %v1382_v49 = vadd.f32 %v1381_v18, %v1295_v14 }
 0x140   :  { %v1430_v28 = vpop.f32.mrf.mxu1  ;;  %v1456_v24 = vrot.slane %v1455_v32, 1 }
 0x141   :  { %v1431_v0 = vadd.f32 %v1430_v28, %v1382_v49 }
 0x142   :  { %v1457_v26 = vadd.f32 %v1456_v24, %v1455_v32  ;;  %v1250_v34 = vpop.f32.mrf.mxu2 }
 0x143   :  { %v1459_v59 = vmul.f32 %v1431_v0, %v3215_v38  ;;  %v1251_v2 = vadd.f32 %v1250_v34, %v1183_v45 }
 0x144   :  { %v1300_v22 = vpop.f32.mrf.mxu3  ;;  %1458 = vst [vmem:[#allocation10] sm:$0x1] %v1457_v26 }
 0x145   :  { %v1301_v41 = vadd.f32 %v1300_v22, %v1246_v39  ;;  %v1385_v56 = vpop.f32.mrf.mxu0  ;;  %1483 = dma.vmem_to_hbm [thread:$0]  %s1479_s17, 16, %s1481_s20, [#allocation4]  }
 0x147   :  { %v1386_v21 = vadd.f32 %v1385_v56, %v1301_v41 }
 0x148   :  { %v1434_v13 = vpop.f32.mrf.mxu1 }
 0x149   :  { %v1435_v58 = vadd.f32 %v1434_v13, %v1386_v21 }
 0x14a   :  { %v1255_v5 = vpop.f32.mrf.mxu2 }
 0x14b   :  { %v1460_v37 = vmul.f32 %v1435_v58, %v3220_v40  ;;  %v1256_v60 = vadd.f32 %v1255_v5, %v1187_v7 }
 0x14c   :  { %v1306_v19 = vpop.f32.mrf.mxu3 }
 0x14d   :  { %v1463_v3 = vadd.f32 %v1460_v37, %v1459_v59  ;;  %v1307_v4 = vadd.f32 %v1306_v19, %v1251_v2  ;;  %v1389_v31 = vpop.f32.mrf.mxu0 }
 0x14f   :  { %v1390_v61 = vadd.f32 %v1389_v31, %v1307_v4 }
 0x150   :  { %v1438_v63 = vpop.f32.mrf.mxu1 }
 0x151   :  { %v1439_v8 = vadd.f32 %v1438_v63, %v1390_v61 }
 0x153   :  { %v1461_v54 = vmul.f32 %v1439_v8, %v3227_v1 }
 0x154   :  { %v1312_v9 = vpop.f32.mrf.mxu3 }
 0x155   :  { %v1464_v44 = vadd.f32 %v1463_v3, %v1461_v54  ;;  %v1313_v43 = vadd.f32 %v1312_v9, %v1256_v60  ;;  %v1393_v16 = vpop.f32.mrf.mxu0 }
 0x157   :  { %v1394_v38 = vadd.f32 %v1393_v16, %v1313_v43 }
 0x158   :  { %v1442_v27 = vpop.f32.mrf.mxu1 }
 0x159   :  { %v1443_v48 = vadd.f32 %v1442_v27, %v1394_v38 }
 0x15b   :  { %v1462_v40 = vmul.f32 %v1443_v48, %v463_v62 }
 0x15d   :  { %v1465_v10 = vadd.f32 %v1464_v44, %v1462_v40 }
 0x15f   :  { %v1466_v36 = vrot.slane %v1465_v10, 4 }
 0x161   :  { %v1467_v50 = vadd.f32 %v1466_v36, %v1465_v10 }
 0x163   :  { %v1468_v12 = vrot.slane %v1467_v50, 2 }
 0x165   :  { %v1469_v51 = vadd.f32 %v1468_v12, %v1467_v50 }
 0x167   :  { %v1470_v1 = vrot.slane %v1469_v51, 1 }
 0x169   :  { %v1471_v35 = vadd.f32 %v1470_v1, %v1469_v51 }
 0x16b   :  { %1472 = vst [vmem:[#allocation11] sm:$0x1] %v1471_v35 }
 0x16c   :  { %1494 = dma.vmem_to_hbm [thread:$0]  %s1490_s21, 16, %s1492_s24, [#allocation12]  }
 0x16d   :  { %1847 = dma.done.wait [#allocation4], 16  }
 0x16e   :  { %1848 = vsyncadd [#allocation4], 4294967280 }
 0x16f   :  { %1849 = dma.done.wait [#allocation12], 16  }
 0x170   :  { %1850 = vsyncadd [#allocation12], 4294967280 }
 0x171   :  { %1503 = vsyncpa [#allocation3], 1 }
 0x172   :  { %1504 = vsyncpa [#allocation6], 1 }
 0x173   :  { %1505 = vsyncpa [#allocation9], 1 }
 0x174   :  { %1506 = vsyncpa [#allocation4], 1 }
 0x175   :  { %1507 = vsyncpa [#allocation12], 1 }

</bundles_post_ra>
